<compile_context>
chip_gen: v7x
topology: tpu7x:2x2x1
jax: 0.10.0
libtpu: 0.0.40
codegen_flags: <defaults>
</compile_context>

<pallas_src>
import functools
import math

import jax
import jax.numpy as jnp
from jax.experimental import pallas as pl
from jax.experimental.pallas import tpu as pltpu


def causal_attn_kernel(x_ref, wa_ref, ba_ref, wp_ref, bp_ref, o_ref,
                       *, n_head: int, q_tile: int, fast_math: bool):
    """One batch element per grid step.

    x_ref : (T, C)    input slab for this batch element
    wa_ref: (C, 3C)   c_attn weight, transposed; softmax scale folded into q cols
    ba_ref: (1, 3C)   c_attn bias (q part pre-scaled), f32
    wp_ref: (C, Np)   c_proj weight, transposed, zero-padded to lane-dense Np
    bp_ref: (1, Np)   c_proj bias, padded, f32
    o_ref : (T, Np)   lane-dense output slab
    """
    T, C = x_ref.shape
    Np = o_ref.shape[-1]
    hd = C // n_head
    mm = jnp.bfloat16 if fast_math else jnp.float32
    tq = q_tile
    n_qt = T // tq

    # Fused QKV projection for the whole sequence of this batch element.
    # (The 1/sqrt(hd) scale is already folded into the q columns of wa/ba.)
    x2 = x_ref[...].astype(mm)
    qkv = jnp.dot(x2, wa_ref[...], preferred_element_type=jnp.float32)
    qkv = qkv + ba_ref[...]                                   # (T, 3C), f32

    bp = bp_ref[...]                                          # (1, Np), f32
    qk_dims = (((1,), (1,)), ((), ()))     # q @ k^T via contraction, no transpose

    # Flash-style attention: q-tiles x heads x (causal-pruned) kv-tiles.
    for qt in range(n_qt):
        rows = slice(qt * tq, (qt + 1) * tq)
        out_acc = jnp.zeros((tq, Np), jnp.float32)            # per-q-tile out proj
        for h in range(n_head):
            lo = h * hd
            q_h = qkv[rows, lo:lo + hd].astype(mm)            # (tq, hd), pre-scaled
            m_i = jnp.full((tq, 1), -jnp.inf, jnp.float32)
            l_i = jnp.zeros((tq, 1), jnp.float32)
            acc = jnp.zeros((tq, hd), jnp.float32)
            # Causal block skipping: kv tiles above the diagonal never computed.
            for kt in range(qt + 1):
                kv = slice(kt * tq, (kt + 1) * tq)
                k_h = qkv[kv, C + lo:C + lo + hd].astype(mm)
                v_h = qkv[kv, 2 * C + lo:2 * C + lo + hd].astype(mm)
                s = jax.lax.dot_general(q_h, k_h, qk_dims,
                                        preferred_element_type=jnp.float32)
                if kt == qt:
                    # Only the diagonal tile needs masking.  The finite -1e30
                    # fill is safe because every row keeps its diagonal element.
                    r = jax.lax.broadcasted_iota(jnp.int32, (tq, tq), 0)
                    c = jax.lax.broadcasted_iota(jnp.int32, (tq, tq), 1)
                    s = jnp.where(r >= c, s, jnp.float32(-1e30))
                m_new = jnp.maximum(m_i, jnp.max(s, axis=-1, keepdims=True))
                alpha = jnp.exp(m_i - m_new)
                p = jnp.exp(s - m_new)                        # (tq, tq), f32
                l_i = alpha * l_i + jnp.sum(p, axis=-1, keepdims=True)
                acc = alpha * acc + jnp.dot(p.astype(mm), v_h,
                                            preferred_element_type=jnp.float32)
                m_i = m_new
            if fast_math:
                inv = pl.reciprocal(l_i, approx=True)         # EUP slot, ~free
            else:
                inv = 1.0 / l_i                               # exact (tiny tensor)
            y_h = (acc * inv).astype(mm)                      # (tq, hd)
            # Per-head accumulated output projection (no head-merge transpose,
            # no concat): out += y_h @ Wp^T[rows of this head].
            out_acc = out_acc + jnp.dot(y_h, wp_ref[lo:lo + hd, :],
                                        preferred_element_type=jnp.float32)
        o_ref[rows, :] = (out_acc + bp).astype(o_ref.dtype)


def causal_self_attention(x, w_attn, b_attn, w_proj, b_proj, n_head,
                          *, fast_math: bool = True, q_tile=None):
    """w_attn: (3C, C), w_proj: (C, C) in the PyTorch nn.Linear convention.

    fast_math=True (default; best on v6e/v7x): bf16 MXU operands with f32
    accumulation and f32 softmax.  fast_math=False: everything in f32.
    """
    B, T, C = x.shape
    assert C % n_head == 0
    hd = C // n_head
    if q_tile is None:
        q_tile = min(T, 128)   # shrink further for v7x (64 MiB VMEM) at huge C
    assert T % q_tile == 0, "T must be divisible by q_tile"
    assert B == 1 or T % 8 == 0, "per-batch block needs T % 8 == 0 (sublane tiling)"

    # Lane-dense output slab: skip padding when C is already a multiple of 128.
    Np = C if C % 128 == 0 else ((C + 127) // 128) * 128
    mm = jnp.bfloat16 if fast_math else jnp.float32
    scale = 1.0 / math.sqrt(hd)

    # One-time layout plumbing in XLA, outside the kernel:
    #  * transpose weights to (in, out) so the kernel never relayouts them,
    #  * fold the softmax scale into the q columns of c_attn (weight + bias),
    #  * zero-pad c_proj to Np output columns (unmasked 128-lane stores).
    wa_t = jnp.asarray(w_attn).astype(jnp.float32).T                   # (C, 3C)
    wa_t = wa_t.at[:, :C].multiply(scale).astype(mm)
    ba2 = jnp.asarray(b_attn).astype(jnp.float32)
    ba2 = ba2.at[:C].multiply(scale).reshape(1, 3 * C)

    wp_t = jnp.asarray(w_proj).astype(mm).T                            # (C, C)
    bp2 = jnp.asarray(b_proj).astype(jnp.float32).reshape(1, C)
    if Np != C:
        wp_t = jnp.zeros((C, Np), mm).at[:, :C].set(wp_t)
        bp2 = jnp.zeros((1, Np), jnp.float32).at[:, :C].set(bp2)

    x2d = x.reshape(B * T, C)                                          # free reshape

    kernel = functools.partial(causal_attn_kernel, n_head=n_head,
                               q_tile=q_tile, fast_math=fast_math)

    # Advisory cost estimate (causal pruning does ~(n_qt+1)/(2*n_qt) of full attn).
    n_qt = T // q_tile
    causal_frac = (n_qt + 1) / (2 * n_qt)
    mm_bytes = 2 if fast_math else 4
    flops = int(2 * B * T * C * 3 * C
                + 2 * 2 * B * n_head * T * T * hd * causal_frac
                + 2 * B * T * C * Np)
    bytes_accessed = int(x.size * x.dtype.itemsize
                         + (wa_t.size + wp_t.size) * mm_bytes
                         + (ba2.size + bp2.size) * 4
                         + B * T * Np * x.dtype.itemsize)
    cost = pl.CostEstimate(flops=flops,
                           transcendentals=int(B * n_head * T * T * causal_frac),
                           bytes_accessed=bytes_accessed)

    # VMEM budget: double-buffered x/out blocks + resident weights + in-kernel f32
    # temporaries (qkv slab, per-tile scores/accumulators), with 2x headroom.
    est = (2 * T * C * x.dtype.itemsize
           + 2 * T * Np * x.dtype.itemsize
           + 2 * (C * 3 * C + C * Np) * mm_bytes
           + 2 * (3 * C + Np) * 4
           + T * 3 * C * 4
           + q_tile * Np * 4
           + 6 * q_tile * q_tile * 4
           + 4 * q_tile * hd * 4)
    vmem_limit = int(min(100 * 2 ** 20, max(32 * 2 ** 20, 2 * est)))

    cparams = pltpu.CompilerParams(
        dimension_semantics=("parallel",),   # >=2 grid steps -> v7x's 2 TensorCores
        vmem_limit_bytes=vmem_limit)

    def run(weight_mode):
        if weight_mode is None:
            wspec = lambda shp: pl.BlockSpec(shp, lambda b: (0, 0))
        else:
            wspec = lambda shp: pl.BlockSpec(shp, lambda b: (0, 0),
                                             pipeline_mode=weight_mode)
        grid_spec = pltpu.PrefetchScalarGridSpec(
            num_scalar_prefetch=0,
            grid=(B,),
            in_specs=[
                pl.BlockSpec((T, C), lambda b: (b, 0)),   # x slab (per batch)
                wspec((C, 3 * C)),                        # W_attn^T (scaled q cols)
                wspec((1, 3 * C)),                        # b_attn
                wspec((C, Np)),                           # W_proj^T (padded)
                wspec((1, Np)),                           # b_proj (padded)
            ],
            out_specs=pl.BlockSpec((T, Np), lambda b: (b, 0)),
        )
        out = pl.pallas_call(
            kernel,
            out_shape=jax.ShapeDtypeStruct((B * T, Np), x.dtype),
            grid_spec=grid_spec,
            compiler_params=cparams,
            cost_estimate=cost,
        )(x2d, wa_t, ba2, wp_t, bp2)
        return jax.block_until_ready(out)

    try:
        # Constant-index weights: single-buffer them (halves their VMEM footprint).
        out2d = run(pl.Buffered(1))
    except Exception:
        # Fallback if this jax build rejects pipeline_mode on pallas_call specs.
        out2d = run(None)

    out2d = out2d if Np == C else out2d[:, :C]
    return out2d.reshape(B, T, C)


def reference(x, w_attn, b_attn, w_proj, b_proj, n_head):
    B, T, C = x.shape
    hd = C // n_head
    qkv = jnp.einsum('btc,oc->bto', x, w_attn) + b_attn
    q, k, v = jnp.split(qkv, 3, axis=-1)

    def heads(a):
        return jnp.transpose(a.reshape(B, T, n_head, hd), (0, 2, 1, 3))

    q, k, v = heads(q), heads(k), heads(v)
    scores = jnp.einsum('bhtd,bhsd->bhts', q, k) / math.sqrt(hd)
    mask = jnp.tril(jnp.ones((T, T), dtype=bool))
    scores = jnp.where(mask[None, None], scores, -jnp.inf)
    attn = jax.nn.softmax(scores, axis=-1)
    y = jnp.einsum('bhts,bhsd->bhtd', attn, v)
    y = jnp.transpose(y, (0, 2, 1, 3)).reshape(B, T, C)
    return jnp.einsum('btc,oc->bto', y, w_proj) + b_proj


if __name__ == "__main__":
    # GPTConfig-like small sizes: block_size >= T
    B, T, C, n_head = 2, 8, 32, 4

    key = jax.random.PRNGKey(0)
    kx, kwa, kba, kwp, kbp = jax.random.split(key, 5)

    x = jax.random.normal(kx, (B, T, C), dtype=jnp.float32)
    bound = 1.0 / math.sqrt(C)
    w_attn = jax.random.uniform(kwa, (3 * C, C), jnp.float32, -bound, bound)
    b_attn = jax.random.uniform(kba, (3 * C,), jnp.float32, -bound, bound)
    w_proj = jax.random.uniform(kwp, (C, C), jnp.float32, -bound, bound)
    b_proj = jax.random.uniform(kbp, (C,), jnp.float32, -bound, bound)

    ref = reference(x, w_attn, b_attn, w_proj, b_proj, n_head)

    # Default path: bf16 MXU operands, f32 accumulation / f32 softmax.
    out_fast = causal_self_attention(x, w_attn, b_attn, w_proj, b_proj, n_head)
    out_fast = jax.block_until_ready(out_fast)
    assert out_fast.shape == (B, T, C)
    assert jnp.allclose(out_fast, ref, atol=3e-2, rtol=3e-2), "bf16 path mismatch"

    # Exact f32 path, tight tolerance.
    out_f32 = causal_self_attention(x, w_attn, b_attn, w_proj, b_proj, n_head,
                                    fast_math=False)
    out_f32 = jax.block_until_ready(out_f32)
    assert jnp.allclose(out_f32, ref, atol=1e-4, rtol=1e-4), "f32 path mismatch"

    # Smaller q-tile: exercises the multi-tile flash loop + causal block skipping.
    out_tiled = causal_self_attention(x, w_attn, b_attn, w_proj, b_proj, n_head,
                                      fast_math=False, q_tile=4)
    out_tiled = jax.block_until_ready(out_tiled)
    assert jnp.allclose(out_tiled, ref, atol=1e-4, rtol=1e-4), "tiled path mismatch"

    print("KERNEL_OK")
</pallas_src>

<mosaic_0001>
module attributes {stable_mosaic.version = 11 : i64} {
  func.func @causal_attn_kernel(%arg0: i32, %arg1: memref<8x32xf32, #tpu.memory_space<vmem>>, %arg2: memref<32x96xbf16, #tpu.memory_space<vmem>>, %arg3: memref<1x96xf32, #tpu.memory_space<vmem>>, %arg4: memref<32x128xbf16, #tpu.memory_space<vmem>>, %arg5: memref<1x128xf32, #tpu.memory_space<vmem>>, %arg6: memref<8x128xf32, #tpu.memory_space<vmem>>) attributes {dimension_semantics = [#tpu.dimension_semantics<parallel>], iteration_bounds = array<i64: 2>, scalar_prefetch = 0 : i64, scratch_operands = 0 : i64, tpu.core_type = #tpu.core_type<tc>, window_params = [{transform_indices = @transform_0, window_bounds = array<i64: 8, 32>}, {pipeline_mode = #tpu.pipeline_mode<synchronous>, transform_indices = @transform_1, window_bounds = array<i64: 32, 96>}, {pipeline_mode = #tpu.pipeline_mode<synchronous>, transform_indices = @transform_2, window_bounds = array<i64: 1, 96>}, {pipeline_mode = #tpu.pipeline_mode<synchronous>, transform_indices = @transform_3, window_bounds = array<i64: 32, 128>}, {pipeline_mode = #tpu.pipeline_mode<synchronous>, transform_indices = @transform_4, window_bounds = array<i64: 1, 128>}, {transform_indices = @transform_5, window_bounds = array<i64: 8, 128>}]} {
    %c0 = arith.constant 0 : index
    %c0_0 = arith.constant 0 : index
    %0 = vector.load %arg1[%c0, %c0_0] : memref<8x32xf32, #tpu.memory_space<vmem>>, vector<8x32xf32>
    %1 = arith.truncf %0 : vector<8x32xf32> to vector<8x32xbf16>
    %c0_1 = arith.constant 0 : index
    %c0_2 = arith.constant 0 : index
    %2 = vector.load %arg2[%c0_1, %c0_2] : memref<32x96xbf16, #tpu.memory_space<vmem>>, vector<32x96xbf16>
    %cst = arith.constant dense<0.000000e+00> : vector<8x96xf32>
    %3 = tpu.matmul %1, %2, %cst {dimension_numbers = #tpu.dot_dimension_numbers<[1], [0], [0], [1], [0, 0, 1, 1], [], []>} : vector<8x32xbf16>, vector<32x96xbf16>, vector<8x96xf32> -> vector<8x96xf32>
    %c0_3 = arith.constant 0 : index
    %c0_4 = arith.constant 0 : index
    %4 = vector.load %arg3[%c0_3, %c0_4] : memref<1x96xf32, #tpu.memory_space<vmem>>, vector<1x96xf32>
    %5 = vector.broadcast %4 : vector<1x96xf32> to vector<8x96xf32>
    %6 = arith.addf %3, %5 : vector<8x96xf32>
    %c0_5 = arith.constant 0 : index
    %c0_6 = arith.constant 0 : index
    %7 = vector.load %arg5[%c0_5, %c0_6] : memref<1x128xf32, #tpu.memory_space<vmem>>, vector<1x128xf32>
    %cst_7 = arith.constant 0.000000e+00 : f32
    %8 = vector.broadcast %cst_7 : f32 to vector<8x128xf32>
    %9 = vector.extract_strided_slice %6 {offsets = [0, 0], sizes = [8, 8], strides = [1, 1]} : vector<8x96xf32> to vector<8x8xf32>
    %10 = arith.truncf %9 : vector<8x8xf32> to vector<8x8xbf16>
    %cst_8 = arith.constant 0xFF800000 : f32
    %11 = vector.broadcast %cst_8 : f32 to vector<8x1xf32>
    %cst_9 = arith.constant 0.000000e+00 : f32
    %12 = vector.broadcast %cst_9 : f32 to vector<8x1xf32>
    %cst_10 = arith.constant 0.000000e+00 : f32
    %13 = vector.broadcast %cst_10 : f32 to vector<8x8xf32>
    %14 = vector.extract_strided_slice %6 {offsets = [0, 32], sizes = [8, 8], strides = [1, 1]} : vector<8x96xf32> to vector<8x8xf32>
    %15 = arith.truncf %14 : vector<8x8xf32> to vector<8x8xbf16>
    %16 = vector.extract_strided_slice %6 {offsets = [0, 64], sizes = [8, 8], strides = [1, 1]} : vector<8x96xf32> to vector<8x8xf32>
    %17 = arith.truncf %16 : vector<8x8xf32> to vector<8x8xbf16>
    %cst_11 = arith.constant dense<0.000000e+00> : vector<8x8xf32>
    %18 = tpu.matmul %10, %15, %cst_11 {dimension_numbers = #tpu.dot_dimension_numbers<[1], [1], [0], [0], [0, 0, 1, 0], [], []>} : vector<8x8xbf16>, vector<8x8xbf16>, vector<8x8xf32> -> vector<8x8xf32>
    %19 = tpu.iota {dimensions = array<i32: 0>} : vector<8x8xi32>
    %20 = tpu.iota {dimensions = array<i32: 1>} : vector<8x8xi32>
    %21 = arith.cmpi sge, %19, %20 : vector<8x8xi32>
    %cst_12 = arith.constant -1.000000e+30 : f32
    %22 = vector.broadcast %cst_12 : f32 to vector<8x8xf32>
    %23 = arith.select %21, %18, %22 : vector<8x8xi1>, vector<8x8xf32>
    %cst_13 = arith.constant dense<0xFF800000> : vector<8xf32>
    %24 = vector.multi_reduction <maximumf>, %23, %cst_13 [1] : vector<8x8xf32> to vector<8xf32>
    %25 = vector.shape_cast %24 : vector<8xf32> to vector<8x1xf32>
    %26 = arith.maximumf %11, %25 : vector<8x1xf32>
    %27 = arith.subf %11, %26 : vector<8x1xf32>
    %28 = math.exp %27 : vector<8x1xf32>
    %29 = vector.broadcast %26 : vector<8x1xf32> to vector<8x8xf32>
    %30 = arith.subf %23, %29 : vector<8x8xf32>
    %31 = math.exp %30 : vector<8x8xf32>
    %32 = arith.mulf %28, %12 : vector<8x1xf32>
    %cst_14 = arith.constant dense<0.000000e+00> : vector<8xf32>
    %33 = vector.multi_reduction <add>, %31, %cst_14 [1] : vector<8x8xf32> to vector<8xf32>
    %34 = vector.shape_cast %33 : vector<8xf32> to vector<8x1xf32>
    %35 = arith.addf %32, %34 : vector<8x1xf32>
    %36 = vector.broadcast %28 : vector<8x1xf32> to vector<8x8xf32>
    %37 = arith.mulf %36, %13 : vector<8x8xf32>
    %38 = arith.truncf %31 : vector<8x8xf32> to vector<8x8xbf16>
    %cst_15 = arith.constant dense<0.000000e+00> : vector<8x8xf32>
    %39 = tpu.matmul %38, %17, %cst_15 {dimension_numbers = #tpu.dot_dimension_numbers<[1], [0], [0], [1], [0, 0, 1, 1], [], []>} : vector<8x8xbf16>, vector<8x8xbf16>, vector<8x8xf32> -> vector<8x8xf32>
    %40 = arith.addf %37, %39 : vector<8x8xf32>
    %41 = tpu.reciprocal %35 {approx = true} : vector<8x1xf32> -> vector<8x1xf32>
    %42 = vector.broadcast %41 : vector<8x1xf32> to vector<8x8xf32>
    %43 = arith.mulf %40, %42 : vector<8x8xf32>
    %44 = arith.truncf %43 : vector<8x8xf32> to vector<8x8xbf16>
    %c0_16 = arith.constant 0 : index
    %c0_17 = arith.constant 0 : index
    %45 = vector.load %arg4[%c0_16, %c0_17] : memref<32x128xbf16, #tpu.memory_space<vmem>>, vector<8x128xbf16>
    %cst_18 = arith.constant dense<0.000000e+00> : vector<8x128xf32>
    %46 = tpu.matmul %44, %45, %cst_18 {dimension_numbers = #tpu.dot_dimension_numbers<[1], [0], [0], [1], [0, 0, 1, 1], [], []>} : vector<8x8xbf16>, vector<8x128xbf16>, vector<8x128xf32> -> vector<8x128xf32>
    %47 = arith.addf %8, %46 : vector<8x128xf32>
    %48 = vector.extract_strided_slice %6 {offsets = [0, 8], sizes = [8, 8], strides = [1, 1]} : vector<8x96xf32> to vector<8x8xf32>
    %49 = arith.truncf %48 : vector<8x8xf32> to vector<8x8xbf16>
    %cst_19 = arith.constant 0xFF800000 : f32
    %50 = vector.broadcast %cst_19 : f32 to vector<8x1xf32>
    %cst_20 = arith.constant 0.000000e+00 : f32
    %51 = vector.broadcast %cst_20 : f32 to vector<8x1xf32>
    %cst_21 = arith.constant 0.000000e+00 : f32
    %52 = vector.broadcast %cst_21 : f32 to vector<8x8xf32>
    %53 = vector.extract_strided_slice %6 {offsets = [0, 40], sizes = [8, 8], strides = [1, 1]} : vector<8x96xf32> to vector<8x8xf32>
    %54 = arith.truncf %53 : vector<8x8xf32> to vector<8x8xbf16>
    %55 = vector.extract_strided_slice %6 {offsets = [0, 72], sizes = [8, 8], strides = [1, 1]} : vector<8x96xf32> to vector<8x8xf32>
    %56 = arith.truncf %55 : vector<8x8xf32> to vector<8x8xbf16>
    %cst_22 = arith.constant dense<0.000000e+00> : vector<8x8xf32>
    %57 = tpu.matmul %49, %54, %cst_22 {dimension_numbers = #tpu.dot_dimension_numbers<[1], [1], [0], [0], [0, 0, 1, 0], [], []>} : vector<8x8xbf16>, vector<8x8xbf16>, vector<8x8xf32> -> vector<8x8xf32>
    %58 = tpu.iota {dimensions = array<i32: 0>} : vector<8x8xi32>
    %59 = tpu.iota {dimensions = array<i32: 1>} : vector<8x8xi32>
    %60 = arith.cmpi sge, %58, %59 : vector<8x8xi32>
    %cst_23 = arith.constant -1.000000e+30 : f32
    %61 = vector.broadcast %cst_23 : f32 to vector<8x8xf32>
    %62 = arith.select %60, %57, %61 : vector<8x8xi1>, vector<8x8xf32>
    %cst_24 = arith.constant dense<0xFF800000> : vector<8xf32>
    %63 = vector.multi_reduction <maximumf>, %62, %cst_24 [1] : vector<8x8xf32> to vector<8xf32>
    %64 = vector.shape_cast %63 : vector<8xf32> to vector<8x1xf32>
    %65 = arith.maximumf %50, %64 : vector<8x1xf32>
    %66 = arith.subf %50, %65 : vector<8x1xf32>
    %67 = math.exp %66 : vector<8x1xf32>
    %68 = vector.broadcast %65 : vector<8x1xf32> to vector<8x8xf32>
    %69 = arith.subf %62, %68 : vector<8x8xf32>
    %70 = math.exp %69 : vector<8x8xf32>
    %71 = arith.mulf %67, %51 : vector<8x1xf32>
    %cst_25 = arith.constant dense<0.000000e+00> : vector<8xf32>
    %72 = vector.multi_reduction <add>, %70, %cst_25 [1] : vector<8x8xf32> to vector<8xf32>
    %73 = vector.shape_cast %72 : vector<8xf32> to vector<8x1xf32>
    %74 = arith.addf %71, %73 : vector<8x1xf32>
    %75 = vector.broadcast %67 : vector<8x1xf32> to vector<8x8xf32>
    %76 = arith.mulf %75, %52 : vector<8x8xf32>
    %77 = arith.truncf %70 : vector<8x8xf32> to vector<8x8xbf16>
    %cst_26 = arith.constant dense<0.000000e+00> : vector<8x8xf32>
    %78 = tpu.matmul %77, %56, %cst_26 {dimension_numbers = #tpu.dot_dimension_numbers<[1], [0], [0], [1], [0, 0, 1, 1], [], []>} : vector<8x8xbf16>, vector<8x8xbf16>, vector<8x8xf32> -> vector<8x8xf32>
    %79 = arith.addf %76, %78 : vector<8x8xf32>
    %80 = tpu.reciprocal %74 {approx = true} : vector<8x1xf32> -> vector<8x1xf32>
    %81 = vector.broadcast %80 : vector<8x1xf32> to vector<8x8xf32>
    %82 = arith.mulf %79, %81 : vector<8x8xf32>
    %83 = arith.truncf %82 : vector<8x8xf32> to vector<8x8xbf16>
    %c8 = arith.constant 8 : index
    %c0_27 = arith.constant 0 : index
    %84 = vector.load %arg4[%c8, %c0_27] : memref<32x128xbf16, #tpu.memory_space<vmem>>, vector<8x128xbf16>
    %cst_28 = arith.constant dense<0.000000e+00> : vector<8x128xf32>
    %85 = tpu.matmul %83, %84, %cst_28 {dimension_numbers = #tpu.dot_dimension_numbers<[1], [0], [0], [1], [0, 0, 1, 1], [], []>} : vector<8x8xbf16>, vector<8x128xbf16>, vector<8x128xf32> -> vector<8x128xf32>
    %86 = arith.addf %47, %85 : vector<8x128xf32>
    %87 = vector.extract_strided_slice %6 {offsets = [0, 16], sizes = [8, 8], strides = [1, 1]} : vector<8x96xf32> to vector<8x8xf32>
    %88 = arith.truncf %87 : vector<8x8xf32> to vector<8x8xbf16>
    %cst_29 = arith.constant 0xFF800000 : f32
    %89 = vector.broadcast %cst_29 : f32 to vector<8x1xf32>
    %cst_30 = arith.constant 0.000000e+00 : f32
    %90 = vector.broadcast %cst_30 : f32 to vector<8x1xf32>
    %cst_31 = arith.constant 0.000000e+00 : f32
    %91 = vector.broadcast %cst_31 : f32 to vector<8x8xf32>
    %92 = vector.extract_strided_slice %6 {offsets = [0, 48], sizes = [8, 8], strides = [1, 1]} : vector<8x96xf32> to vector<8x8xf32>
    %93 = arith.truncf %92 : vector<8x8xf32> to vector<8x8xbf16>
    %94 = vector.extract_strided_slice %6 {offsets = [0, 80], sizes = [8, 8], strides = [1, 1]} : vector<8x96xf32> to vector<8x8xf32>
    %95 = arith.truncf %94 : vector<8x8xf32> to vector<8x8xbf16>
    %cst_32 = arith.constant dense<0.000000e+00> : vector<8x8xf32>
    %96 = tpu.matmul %88, %93, %cst_32 {dimension_numbers = #tpu.dot_dimension_numbers<[1], [1], [0], [0], [0, 0, 1, 0], [], []>} : vector<8x8xbf16>, vector<8x8xbf16>, vector<8x8xf32> -> vector<8x8xf32>
    %97 = tpu.iota {dimensions = array<i32: 0>} : vector<8x8xi32>
    %98 = tpu.iota {dimensions = array<i32: 1>} : vector<8x8xi32>
    %99 = arith.cmpi sge, %97, %98 : vector<8x8xi32>
    %cst_33 = arith.constant -1.000000e+30 : f32
    %100 = vector.broadcast %cst_33 : f32 to vector<8x8xf32>
    %101 = arith.select %99, %96, %100 : vector<8x8xi1>, vector<8x8xf32>
    %cst_34 = arith.constant dense<0xFF800000> : vector<8xf32>
    %102 = vector.multi_reduction <maximumf>, %101, %cst_34 [1] : vector<8x8xf32> to vector<8xf32>
    %103 = vector.shape_cast %102 : vector<8xf32> to vector<8x1xf32>
    %104 = arith.maximumf %89, %103 : vector<8x1xf32>
    %105 = arith.subf %89, %104 : vector<8x1xf32>
    %106 = math.exp %105 : vector<8x1xf32>
    %107 = vector.broadcast %104 : vector<8x1xf32> to vector<8x8xf32>
    %108 = arith.subf %101, %107 : vector<8x8xf32>
    %109 = math.exp %108 : vector<8x8xf32>
    %110 = arith.mulf %106, %90 : vector<8x1xf32>
    %cst_35 = arith.constant dense<0.000000e+00> : vector<8xf32>
    %111 = vector.multi_reduction <add>, %109, %cst_35 [1] : vector<8x8xf32> to vector<8xf32>
    %112 = vector.shape_cast %111 : vector<8xf32> to vector<8x1xf32>
    %113 = arith.addf %110, %112 : vector<8x1xf32>
    %114 = vector.broadcast %106 : vector<8x1xf32> to vector<8x8xf32>
    %115 = arith.mulf %114, %91 : vector<8x8xf32>
    %116 = arith.truncf %109 : vector<8x8xf32> to vector<8x8xbf16>
    %cst_36 = arith.constant dense<0.000000e+00> : vector<8x8xf32>
    %117 = tpu.matmul %116, %95, %cst_36 {dimension_numbers = #tpu.dot_dimension_numbers<[1], [0], [0], [1], [0, 0, 1, 1], [], []>} : vector<8x8xbf16>, vector<8x8xbf16>, vector<8x8xf32> -> vector<8x8xf32>
    %118 = arith.addf %115, %117 : vector<8x8xf32>
    %119 = tpu.reciprocal %113 {approx = true} : vector<8x1xf32> -> vector<8x1xf32>
    %120 = vector.broadcast %119 : vector<8x1xf32> to vector<8x8xf32>
    %121 = arith.mulf %118, %120 : vector<8x8xf32>
    %122 = arith.truncf %121 : vector<8x8xf32> to vector<8x8xbf16>
    %c16 = arith.constant 16 : index
    %c0_37 = arith.constant 0 : index
    %123 = vector.load %arg4[%c16, %c0_37] : memref<32x128xbf16, #tpu.memory_space<vmem>>, vector<8x128xbf16>
    %cst_38 = arith.constant dense<0.000000e+00> : vector<8x128xf32>
    %124 = tpu.matmul %122, %123, %cst_38 {dimension_numbers = #tpu.dot_dimension_numbers<[1], [0], [0], [1], [0, 0, 1, 1], [], []>} : vector<8x8xbf16>, vector<8x128xbf16>, vector<8x128xf32> -> vector<8x128xf32>
    %125 = arith.addf %86, %124 : vector<8x128xf32>
    %126 = vector.extract_strided_slice %6 {offsets = [0, 24], sizes = [8, 8], strides = [1, 1]} : vector<8x96xf32> to vector<8x8xf32>
    %127 = arith.truncf %126 : vector<8x8xf32> to vector<8x8xbf16>
    %cst_39 = arith.constant 0xFF800000 : f32
    %128 = vector.broadcast %cst_39 : f32 to vector<8x1xf32>
    %cst_40 = arith.constant 0.000000e+00 : f32
    %129 = vector.broadcast %cst_40 : f32 to vector<8x1xf32>
    %cst_41 = arith.constant 0.000000e+00 : f32
    %130 = vector.broadcast %cst_41 : f32 to vector<8x8xf32>
    %131 = vector.extract_strided_slice %6 {offsets = [0, 56], sizes = [8, 8], strides = [1, 1]} : vector<8x96xf32> to vector<8x8xf32>
    %132 = arith.truncf %131 : vector<8x8xf32> to vector<8x8xbf16>
    %133 = vector.extract_strided_slice %6 {offsets = [0, 88], sizes = [8, 8], strides = [1, 1]} : vector<8x96xf32> to vector<8x8xf32>
    %134 = arith.truncf %133 : vector<8x8xf32> to vector<8x8xbf16>
    %cst_42 = arith.constant dense<0.000000e+00> : vector<8x8xf32>
    %135 = tpu.matmul %127, %132, %cst_42 {dimension_numbers = #tpu.dot_dimension_numbers<[1], [1], [0], [0], [0, 0, 1, 0], [], []>} : vector<8x8xbf16>, vector<8x8xbf16>, vector<8x8xf32> -> vector<8x8xf32>
    %136 = tpu.iota {dimensions = array<i32: 0>} : vector<8x8xi32>
    %137 = tpu.iota {dimensions = array<i32: 1>} : vector<8x8xi32>
    %138 = arith.cmpi sge, %136, %137 : vector<8x8xi32>
    %cst_43 = arith.constant -1.000000e+30 : f32
    %139 = vector.broadcast %cst_43 : f32 to vector<8x8xf32>
    %140 = arith.select %138, %135, %139 : vector<8x8xi1>, vector<8x8xf32>
    %cst_44 = arith.constant dense<0xFF800000> : vector<8xf32>
    %141 = vector.multi_reduction <maximumf>, %140, %cst_44 [1] : vector<8x8xf32> to vector<8xf32>
    %142 = vector.shape_cast %141 : vector<8xf32> to vector<8x1xf32>
    %143 = arith.maximumf %128, %142 : vector<8x1xf32>
    %144 = arith.subf %128, %143 : vector<8x1xf32>
    %145 = math.exp %144 : vector<8x1xf32>
    %146 = vector.broadcast %143 : vector<8x1xf32> to vector<8x8xf32>
    %147 = arith.subf %140, %146 : vector<8x8xf32>
    %148 = math.exp %147 : vector<8x8xf32>
    %149 = arith.mulf %145, %129 : vector<8x1xf32>
    %cst_45 = arith.constant dense<0.000000e+00> : vector<8xf32>
    %150 = vector.multi_reduction <add>, %148, %cst_45 [1] : vector<8x8xf32> to vector<8xf32>
    %151 = vector.shape_cast %150 : vector<8xf32> to vector<8x1xf32>
    %152 = arith.addf %149, %151 : vector<8x1xf32>
    %153 = vector.broadcast %145 : vector<8x1xf32> to vector<8x8xf32>
    %154 = arith.mulf %153, %130 : vector<8x8xf32>
    %155 = arith.truncf %148 : vector<8x8xf32> to vector<8x8xbf16>
    %cst_46 = arith.constant dense<0.000000e+00> : vector<8x8xf32>
    %156 = tpu.matmul %155, %134, %cst_46 {dimension_numbers = #tpu.dot_dimension_numbers<[1], [0], [0], [1], [0, 0, 1, 1], [], []>} : vector<8x8xbf16>, vector<8x8xbf16>, vector<8x8xf32> -> vector<8x8xf32>
    %157 = arith.addf %154, %156 : vector<8x8xf32>
    %158 = tpu.reciprocal %152 {approx = true} : vector<8x1xf32> -> vector<8x1xf32>
    %159 = vector.broadcast %158 : vector<8x1xf32> to vector<8x8xf32>
    %160 = arith.mulf %157, %159 : vector<8x8xf32>
    %161 = arith.truncf %160 : vector<8x8xf32> to vector<8x8xbf16>
    %c24 = arith.constant 24 : index
    %c0_47 = arith.constant 0 : index
    %162 = vector.load %arg4[%c24, %c0_47] : memref<32x128xbf16, #tpu.memory_space<vmem>>, vector<8x128xbf16>
    %cst_48 = arith.constant dense<0.000000e+00> : vector<8x128xf32>
    %163 = tpu.matmul %161, %162, %cst_48 {dimension_numbers = #tpu.dot_dimension_numbers<[1], [0], [0], [1], [0, 0, 1, 1], [], []>} : vector<8x8xbf16>, vector<8x128xbf16>, vector<8x128xf32> -> vector<8x128xf32>
    %164 = arith.addf %125, %163 : vector<8x128xf32>
    %165 = vector.broadcast %7 : vector<1x128xf32> to vector<8x128xf32>
    %166 = arith.addf %164, %165 : vector<8x128xf32>
    %c0_49 = arith.constant 0 : index
    %c0_50 = arith.constant 0 : index
    %167 = vector.load %arg6[%c0_49, %c0_50] : memref<8x128xf32, #tpu.memory_space<vmem>>, vector<8x128xf32>
    tpu.vector_store %arg6[%c0_49, %c0_50], %166 {strides = array<i32>} : memref<8x128xf32, #tpu.memory_space<vmem>>, vector<8x128xf32>,
    return
  }
  func.func @transform_0(%arg0: i32) -> (i32, i32) {
    %c0_i32 = arith.constant 0 : i32
    %c0_i32_0 = arith.constant 0 : i32
    return %arg0, %c0_i32 : i32, i32
  }
  func.func @transform_1(%arg0: i32) -> (i32, i32) {
    %c0_i32 = arith.constant 0 : i32
    %c0_i32_0 = arith.constant 0 : i32
    %c0_i32_1 = arith.constant 0 : i32
    return %c0_i32, %c0_i32_0 : i32, i32
  }
  func.func @transform_2(%arg0: i32) -> (i32, i32) {
    %c0_i32 = arith.constant 0 : i32
    %c0_i32_0 = arith.constant 0 : i32
    %c0_i32_1 = arith.constant 0 : i32
    return %c0_i32, %c0_i32_0 : i32, i32
  }
  func.func @transform_3(%arg0: i32) -> (i32, i32) {
    %c0_i32 = arith.constant 0 : i32
    %c0_i32_0 = arith.constant 0 : i32
    %c0_i32_1 = arith.constant 0 : i32
    return %c0_i32, %c0_i32_0 : i32, i32
  }
  func.func @transform_4(%arg0: i32) -> (i32, i32) {
    %c0_i32 = arith.constant 0 : i32
    %c0_i32_0 = arith.constant 0 : i32
    %c0_i32_1 = arith.constant 0 : i32
    return %c0_i32, %c0_i32_0 : i32, i32
  }
  func.func @transform_5(%arg0: i32) -> (i32, i32) {
    %c0_i32 = arith.constant 0 : i32
    %c0_i32_0 = arith.constant 0 : i32
    return %arg0, %c0_i32 : i32, i32
  }
}

module attributes {stable_mosaic.version = 11 : i64} {
  func.func @causal_attn_kernel(%arg0: i32, %arg1: memref<8x32xf32, #tpu.memory_space<vmem>>, %arg2: memref<32x96xbf16, #tpu.memory_space<vmem>>, %arg3: memref<1x96xf32, #tpu.memory_space<vmem>>, %arg4: memref<32x128xbf16, #tpu.memory_space<vmem>>, %arg5: memref<1x128xf32, #tpu.memory_space<vmem>>, %arg6: memref<8x128xf32, #tpu.memory_space<vmem>>) attributes {dimension_semantics = [#tpu.dimension_semantics<parallel>], iteration_bounds = array<i64: 2>, scalar_prefetch = 0 : i64, scratch_operands = 0 : i64, tpu.core_type = #tpu.core_type<tc>, window_params = [{transform_indices = @transform_0, window_bounds = array<i64: 8, 32>}, {pipeline_mode = #tpu.pipeline_mode<synchronous>, transform_indices = @transform_1, window_bounds = array<i64: 32, 96>}, {pipeline_mode = #tpu.pipeline_mode<synchronous>, transform_indices = @transform_2, window_bounds = array<i64: 1, 96>}, {pipeline_mode = #tpu.pipeline_mode<synchronous>, transform_indices = @transform_3, window_bounds = array<i64: 32, 128>}, {pipeline_mode = #tpu.pipeline_mode<synchronous>, transform_indices = @transform_4, window_bounds = array<i64: 1, 128>}, {transform_indices = @transform_5, window_bounds = array<i64: 8, 128>}]} {
    %c0 = arith.constant 0 : index
    %c0_0 = arith.constant 0 : index
    %0 = vector.load %arg1[%c0, %c0_0] : memref<8x32xf32, #tpu.memory_space<vmem>>, vector<8x32xf32>
    %1 = arith.truncf %0 : vector<8x32xf32> to vector<8x32xbf16>
    %c0_1 = arith.constant 0 : index
    %c0_2 = arith.constant 0 : index
    %2 = vector.load %arg2[%c0_1, %c0_2] : memref<32x96xbf16, #tpu.memory_space<vmem>>, vector<32x96xbf16>
    %cst = arith.constant dense<0.000000e+00> : vector<8x96xf32>
    %3 = tpu.matmul %1, %2, %cst {dimension_numbers = #tpu.dot_dimension_numbers<[1], [0], [0], [1], [0, 0, 1, 1], [], []>} : vector<8x32xbf16>, vector<32x96xbf16>, vector<8x96xf32> -> vector<8x96xf32>
    %c0_3 = arith.constant 0 : index
    %c0_4 = arith.constant 0 : index
    %4 = vector.load %arg3[%c0_3, %c0_4] : memref<1x96xf32, #tpu.memory_space<vmem>>, vector<1x96xf32>
    %5 = vector.broadcast %4 : vector<1x96xf32> to vector<8x96xf32>
    %6 = arith.addf %3, %5 : vector<8x96xf32>
    %c0_5 = arith.constant 0 : index
    %c0_6 = arith.constant 0 : index
    %7 = vector.load %arg5[%c0_5, %c0_6] : memref<1x128xf32, #tpu.memory_space<vmem>>, vector<1x128xf32>
    %cst_7 = arith.constant 0.000000e+00 : f32
    %8 = vector.broadcast %cst_7 : f32 to vector<8x128xf32>
    %9 = vector.extract_strided_slice %6 {offsets = [0, 0], sizes = [8, 8], strides = [1, 1]} : vector<8x96xf32> to vector<8x8xf32>
    %10 = arith.truncf %9 : vector<8x8xf32> to vector<8x8xbf16>
    %cst_8 = arith.constant 0xFF800000 : f32
    %11 = vector.broadcast %cst_8 : f32 to vector<8x1xf32>
    %cst_9 = arith.constant 0.000000e+00 : f32
    %12 = vector.broadcast %cst_9 : f32 to vector<8x1xf32>
    %cst_10 = arith.constant 0.000000e+00 : f32
    %13 = vector.broadcast %cst_10 : f32 to vector<8x8xf32>
    %14 = vector.extract_strided_slice %6 {offsets = [0, 32], sizes = [8, 8], strides = [1, 1]} : vector<8x96xf32> to vector<8x8xf32>
    %15 = arith.truncf %14 : vector<8x8xf32> to vector<8x8xbf16>
    %16 = vector.extract_strided_slice %6 {offsets = [0, 64], sizes = [8, 8], strides = [1, 1]} : vector<8x96xf32> to vector<8x8xf32>
    %17 = arith.truncf %16 : vector<8x8xf32> to vector<8x8xbf16>
    %cst_11 = arith.constant dense<0.000000e+00> : vector<8x8xf32>
    %18 = tpu.matmul %10, %15, %cst_11 {dimension_numbers = #tpu.dot_dimension_numbers<[1], [1], [0], [0], [0, 0, 1, 0], [], []>} : vector<8x8xbf16>, vector<8x8xbf16>, vector<8x8xf32> -> vector<8x8xf32>
    %19 = tpu.iota {dimensions = array<i32: 0>} : vector<8x8xi32>
    %20 = tpu.iota {dimensions = array<i32: 1>} : vector<8x8xi32>
    %21 = arith.cmpi sge, %19, %20 : vector<8x8xi32>
    %cst_12 = arith.constant -1.000000e+30 : f32
    %22 = vector.broadcast %cst_12 : f32 to vector<8x8xf32>
    %23 = arith.select %21, %18, %22 : vector<8x8xi1>, vector<8x8xf32>
    %cst_13 = arith.constant dense<0xFF800000> : vector<8xf32>
    %24 = vector.multi_reduction <maximumf>, %23, %cst_13 [1] : vector<8x8xf32> to vector<8xf32>
    %25 = vector.shape_cast %24 : vector<8xf32> to vector<8x1xf32>
    %26 = arith.maximumf %11, %25 : vector<8x1xf32>
    %27 = arith.subf %11, %26 : vector<8x1xf32>
    %28 = math.exp %27 : vector<8x1xf32>
    %29 = vector.broadcast %26 : vector<8x1xf32> to vector<8x8xf32>
    %30 = arith.subf %23, %29 : vector<8x8xf32>
    %31 = math.exp %30 : vector<8x8xf32>
    %32 = arith.mulf %28, %12 : vector<8x1xf32>
    %cst_14 = arith.constant dense<0.000000e+00> : vector<8xf32>
    %33 = vector.multi_reduction <add>, %31, %cst_14 [1] : vector<8x8xf32> to vector<8xf32>
    %34 = vector.shape_cast %33 : vector<8xf32> to vector<8x1xf32>
    %35 = arith.addf %32, %34 : vector<8x1xf32>
    %36 = vector.broadcast %28 : vector<8x1xf32> to vector<8x8xf32>
    %37 = arith.mulf %36, %13 : vector<8x8xf32>
    %38 = arith.truncf %31 : vector<8x8xf32> to vector<8x8xbf16>
    %cst_15 = arith.constant dense<0.000000e+00> : vector<8x8xf32>
    %39 = tpu.matmul %38, %17, %cst_15 {dimension_numbers = #tpu.dot_dimension_numbers<[1], [0], [0], [1], [0, 0, 1, 1], [], []>} : vector<8x8xbf16>, vector<8x8xbf16>, vector<8x8xf32> -> vector<8x8xf32>
    %40 = arith.addf %37, %39 : vector<8x8xf32>
    %41 = tpu.reciprocal %35 {approx = true} : vector<8x1xf32> -> vector<8x1xf32>
    %42 = vector.broadcast %41 : vector<8x1xf32> to vector<8x8xf32>
    %43 = arith.mulf %40, %42 : vector<8x8xf32>
    %44 = arith.truncf %43 : vector<8x8xf32> to vector<8x8xbf16>
    %c0_16 = arith.constant 0 : index
    %c0_17 = arith.constant 0 : index
    %45 = vector.load %arg4[%c0_16, %c0_17] : memref<32x128xbf16, #tpu.memory_space<vmem>>, vector<8x128xbf16>
    %cst_18 = arith.constant dense<0.000000e+00> : vector<8x128xf32>
    %46 = tpu.matmul %44, %45, %cst_18 {dimension_numbers = #tpu.dot_dimension_numbers<[1], [0], [0], [1], [0, 0, 1, 1], [], []>} : vector<8x8xbf16>, vector<8x128xbf16>, vector<8x128xf32> -> vector<8x128xf32>
    %47 = arith.addf %8, %46 : vector<8x128xf32>
    %48 = vector.extract_strided_slice %6 {offsets = [0, 8], sizes = [8, 8], strides = [1, 1]} : vector<8x96xf32> to vector<8x8xf32>
    %49 = arith.truncf %48 : vector<8x8xf32> to vector<8x8xbf16>
    %cst_19 = arith.constant 0xFF800000 : f32
    %50 = vector.broadcast %cst_19 : f32 to vector<8x1xf32>
    %cst_20 = arith.constant 0.000000e+00 : f32
    %51 = vector.broadcast %cst_20 : f32 to vector<8x1xf32>
    %cst_21 = arith.constant 0.000000e+00 : f32
    %52 = vector.broadcast %cst_21 : f32 to vector<8x8xf32>
    %53 = vector.extract_strided_slice %6 {offsets = [0, 40], sizes = [8, 8], strides = [1, 1]} : vector<8x96xf32> to vector<8x8xf32>
    %54 = arith.truncf %53 : vector<8x8xf32> to vector<8x8xbf16>
    %55 = vector.extract_strided_slice %6 {offsets = [0, 72], sizes = [8, 8], strides = [1, 1]} : vector<8x96xf32> to vector<8x8xf32>
    %56 = arith.truncf %55 : vector<8x8xf32> to vector<8x8xbf16>
    %cst_22 = arith.constant dense<0.000000e+00> : vector<8x8xf32>
    %57 = tpu.matmul %49, %54, %cst_22 {dimension_numbers = #tpu.dot_dimension_numbers<[1], [1], [0], [0], [0, 0, 1, 0], [], []>} : vector<8x8xbf16>, vector<8x8xbf16>, vector<8x8xf32> -> vector<8x8xf32>
    %58 = tpu.iota {dimensions = array<i32: 0>} : vector<8x8xi32>
    %59 = tpu.iota {dimensions = array<i32: 1>} : vector<8x8xi32>
    %60 = arith.cmpi sge, %58, %59 : vector<8x8xi32>
    %cst_23 = arith.constant -1.000000e+30 : f32
    %61 = vector.broadcast %cst_23 : f32 to vector<8x8xf32>
    %62 = arith.select %60, %57, %61 : vector<8x8xi1>, vector<8x8xf32>
    %cst_24 = arith.constant dense<0xFF800000> : vector<8xf32>
    %63 = vector.multi_reduction <maximumf>, %62, %cst_24 [1] : vector<8x8xf32> to vector<8xf32>
    %64 = vector.shape_cast %63 : vector<8xf32> to vector<8x1xf32>
    %65 = arith.maximumf %50, %64 : vector<8x1xf32>
    %66 = arith.subf %50, %65 : vector<8x1xf32>
    %67 = math.exp %66 : vector<8x1xf32>
    %68 = vector.broadcast %65 : vector<8x1xf32> to vector<8x8xf32>
    %69 = arith.subf %62, %68 : vector<8x8xf32>
    %70 = math.exp %69 : vector<8x8xf32>
    %71 = arith.mulf %67, %51 : vector<8x1xf32>
    %cst_25 = arith.constant dense<0.000000e+00> : vector<8xf32>
    %72 = vector.multi_reduction <add>, %70, %cst_25 [1] : vector<8x8xf32> to vector<8xf32>
    %73 = vector.shape_cast %72 : vector<8xf32> to vector<8x1xf32>
    %74 = arith.addf %71, %73 : vector<8x1xf32>
    %75 = vector.broadcast %67 : vector<8x1xf32> to vector<8x8xf32>
    %76 = arith.mulf %75, %52 : vector<8x8xf32>
    %77 = arith.truncf %70 : vector<8x8xf32> to vector<8x8xbf16>
    %cst_26 = arith.constant dense<0.000000e+00> : vector<8x8xf32>
    %78 = tpu.matmul %77, %56, %cst_26 {dimension_numbers = #tpu.dot_dimension_numbers<[1], [0], [0], [1], [0, 0, 1, 1], [], []>} : vector<8x8xbf16>, vector<8x8xbf16>, vector<8x8xf32> -> vector<8x8xf32>
    %79 = arith.addf %76, %78 : vector<8x8xf32>
    %80 = tpu.reciprocal %74 {approx = true} : vector<8x1xf32> -> vector<8x1xf32>
    %81 = vector.broadcast %80 : vector<8x1xf32> to vector<8x8xf32>
    %82 = arith.mulf %79, %81 : vector<8x8xf32>
    %83 = arith.truncf %82 : vector<8x8xf32> to vector<8x8xbf16>
    %c8 = arith.constant 8 : index
    %c0_27 = arith.constant 0 : index
    %84 = vector.load %arg4[%c8, %c0_27] : memref<32x128xbf16, #tpu.memory_space<vmem>>, vector<8x128xbf16>
    %cst_28 = arith.constant dense<0.000000e+00> : vector<8x128xf32>
    %85 = tpu.matmul %83, %84, %cst_28 {dimension_numbers = #tpu.dot_dimension_numbers<[1], [0], [0], [1], [0, 0, 1, 1], [], []>} : vector<8x8xbf16>, vector<8x128xbf16>, vector<8x128xf32> -> vector<8x128xf32>
    %86 = arith.addf %47, %85 : vector<8x128xf32>
    %87 = vector.extract_strided_slice %6 {offsets = [0, 16], sizes = [8, 8], strides = [1, 1]} : vector<8x96xf32> to vector<8x8xf32>
    %88 = arith.truncf %87 : vector<8x8xf32> to vector<8x8xbf16>
    %cst_29 = arith.constant 0xFF800000 : f32
    %89 = vector.broadcast %cst_29 : f32 to vector<8x1xf32>
    %cst_30 = arith.constant 0.000000e+00 : f32
    %90 = vector.broadcast %cst_30 : f32 to vector<8x1xf32>
    %cst_31 = arith.constant 0.000000e+00 : f32
    %91 = vector.broadcast %cst_31 : f32 to vector<8x8xf32>
    %92 = vector.extract_strided_slice %6 {offsets = [0, 48], sizes = [8, 8], strides = [1, 1]} : vector<8x96xf32> to vector<8x8xf32>
    %93 = arith.truncf %92 : vector<8x8xf32> to vector<8x8xbf16>
    %94 = vector.extract_strided_slice %6 {offsets = [0, 80], sizes = [8, 8], strides = [1, 1]} : vector<8x96xf32> to vector<8x8xf32>
    %95 = arith.truncf %94 : vector<8x8xf32> to vector<8x8xbf16>
    %cst_32 = arith.constant dense<0.000000e+00> : vector<8x8xf32>
    %96 = tpu.matmul %88, %93, %cst_32 {dimension_numbers = #tpu.dot_dimension_numbers<[1], [1], [0], [0], [0, 0, 1, 0], [], []>} : vector<8x8xbf16>, vector<8x8xbf16>, vector<8x8xf32> -> vector<8x8xf32>
    %97 = tpu.iota {dimensions = array<i32: 0>} : vector<8x8xi32>
    %98 = tpu.iota {dimensions = array<i32: 1>} : vector<8x8xi32>
    %99 = arith.cmpi sge, %97, %98 : vector<8x8xi32>
    %cst_33 = arith.constant -1.000000e+30 : f32
    %100 = vector.broadcast %cst_33 : f32 to vector<8x8xf32>
    %101 = arith.select %99, %96, %100 : vector<8x8xi1>, vector<8x8xf32>
    %cst_34 = arith.constant dense<0xFF800000> : vector<8xf32>
    %102 = vector.multi_reduction <maximumf>, %101, %cst_34 [1] : vector<8x8xf32> to vector<8xf32>
    %103 = vector.shape_cast %102 : vector<8xf32> to vector<8x1xf32>
    %104 = arith.maximumf %89, %103 : vector<8x1xf32>
    %105 = arith.subf %89, %104 : vector<8x1xf32>
    %106 = math.exp %105 : vector<8x1xf32>
    %107 = vector.broadcast %104 : vector<8x1xf32> to vector<8x8xf32>
    %108 = arith.subf %101, %107 : vector<8x8xf32>
    %109 = math.exp %108 : vector<8x8xf32>
    %110 = arith.mulf %106, %90 : vector<8x1xf32>
    %cst_35 = arith.constant dense<0.000000e+00> : vector<8xf32>
    %111 = vector.multi_reduction <add>, %109, %cst_35 [1] : vector<8x8xf32> to vector<8xf32>
    %112 = vector.shape_cast %111 : vector<8xf32> to vector<8x1xf32>
    %113 = arith.addf %110, %112 : vector<8x1xf32>
    %114 = vector.broadcast %106 : vector<8x1xf32> to vector<8x8xf32>
    %115 = arith.mulf %114, %91 : vector<8x8xf32>
    %116 = arith.truncf %109 : vector<8x8xf32> to vector<8x8xbf16>
    %cst_36 = arith.constant dense<0.000000e+00> : vector<8x8xf32>
    %117 = tpu.matmul %116, %95, %cst_36 {dimension_numbers = #tpu.dot_dimension_numbers<[1], [0], [0], [1], [0, 0, 1, 1], [], []>} : vector<8x8xbf16>, vector<8x8xbf16>, vector<8x8xf32> -> vector<8x8xf32>
    %118 = arith.addf %115, %117 : vector<8x8xf32>
    %119 = tpu.reciprocal %113 {approx = true} : vector<8x1xf32> -> vector<8x1xf32>
    %120 = vector.broadcast %119 : vector<8x1xf32> to vector<8x8xf32>
    %121 = arith.mulf %118, %120 : vector<8x8xf32>
    %122 = arith.truncf %121 : vector<8x8xf32> to vector<8x8xbf16>
    %c16 = arith.constant 16 : index
    %c0_37 = arith.constant 0 : index
    %123 = vector.load %arg4[%c16, %c0_37] : memref<32x128xbf16, #tpu.memory_space<vmem>>, vector<8x128xbf16>
    %cst_38 = arith.constant dense<0.000000e+00> : vector<8x128xf32>
    %124 = tpu.matmul %122, %123, %cst_38 {dimension_numbers = #tpu.dot_dimension_numbers<[1], [0], [0], [1], [0, 0, 1, 1], [], []>} : vector<8x8xbf16>, vector<8x128xbf16>, vector<8x128xf32> -> vector<8x128xf32>
    %125 = arith.addf %86, %124 : vector<8x128xf32>
    %126 = vector.extract_strided_slice %6 {offsets = [0, 24], sizes = [8, 8], strides = [1, 1]} : vector<8x96xf32> to vector<8x8xf32>
    %127 = arith.truncf %126 : vector<8x8xf32> to vector<8x8xbf16>
    %cst_39 = arith.constant 0xFF800000 : f32
    %128 = vector.broadcast %cst_39 : f32 to vector<8x1xf32>
    %cst_40 = arith.constant 0.000000e+00 : f32
    %129 = vector.broadcast %cst_40 : f32 to vector<8x1xf32>
    %cst_41 = arith.constant 0.000000e+00 : f32
    %130 = vector.broadcast %cst_41 : f32 to vector<8x8xf32>
    %131 = vector.extract_strided_slice %6 {offsets = [0, 56], sizes = [8, 8], strides = [1, 1]} : vector<8x96xf32> to vector<8x8xf32>
    %132 = arith.truncf %131 : vector<8x8xf32> to vector<8x8xbf16>
    %133 = vector.extract_strided_slice %6 {offsets = [0, 88], sizes = [8, 8], strides = [1, 1]} : vector<8x96xf32> to vector<8x8xf32>
    %134 = arith.truncf %133 : vector<8x8xf32> to vector<8x8xbf16>
    %cst_42 = arith.constant dense<0.000000e+00> : vector<8x8xf32>
    %135 = tpu.matmul %127, %132, %cst_42 {dimension_numbers = #tpu.dot_dimension_numbers<[1], [1], [0], [0], [0, 0, 1, 0], [], []>} : vector<8x8xbf16>, vector<8x8xbf16>, vector<8x8xf32> -> vector<8x8xf32>
    %136 = tpu.iota {dimensions = array<i32: 0>} : vector<8x8xi32>
    %137 = tpu.iota {dimensions = array<i32: 1>} : vector<8x8xi32>
    %138 = arith.cmpi sge, %136, %137 : vector<8x8xi32>
    %cst_43 = arith.constant -1.000000e+30 : f32
    %139 = vector.broadcast %cst_43 : f32 to vector<8x8xf32>
    %140 = arith.select %138, %135, %139 : vector<8x8xi1>, vector<8x8xf32>
    %cst_44 = arith.constant dense<0xFF800000> : vector<8xf32>
    %141 = vector.multi_reduction <maximumf>, %140, %cst_44 [1] : vector<8x8xf32> to vector<8xf32>
    %142 = vector.shape_cast %141 : vector<8xf32> to vector<8x1xf32>
    %143 = arith.maximumf %128, %142 : vector<8x1xf32>
    %144 = arith.subf %128, %143 : vector<8x1xf32>
    %145 = math.exp %144 : vector<8x1xf32>
    %146 = vector.broadcast %143 : vector<8x1xf32> to vector<8x8xf32>
    %147 = arith.subf %140, %146 : vector<8x8xf32>
    %148 = math.exp %147 : vector<8x8xf32>
    %149 = arith.mulf %145, %129 : vector<8x1xf32>
    %cst_45 = arith.constant dense<0.000000e+00> : vector<8xf32>
    %150 = vector.multi_reduction <add>, %148, %cst_45 [1] : vector<8x8xf32> to vector<8xf32>
    %151 = vector.shape_cast %150 : vector<8xf32> to vector<8x1xf32>
    %152 = arith.addf %149, %151 : vector<8x1xf32>
    %153 = vector.broadcast %145 : vector<8x1xf32> to vector<8x8xf32>
    %154 = arith.mulf %153, %130 : vector<8x8xf32>
    %155 = arith.truncf %148 : vector<8x8xf32> to vector<8x8xbf16>
    %cst_46 = arith.constant dense<0.000000e+00> : vector<8x8xf32>
    %156 = tpu.matmul %155, %134, %cst_46 {dimension_numbers = #tpu.dot_dimension_numbers<[1], [0], [0], [1], [0, 0, 1, 1], [], []>} : vector<8x8xbf16>, vector<8x8xbf16>, vector<8x8xf32> -> vector<8x8xf32>
    %157 = arith.addf %154, %156 : vector<8x8xf32>
    %158 = tpu.reciprocal %152 {approx = true} : vector<8x1xf32> -> vector<8x1xf32>
    %159 = vector.broadcast %158 : vector<8x1xf32> to vector<8x8xf32>
    %160 = arith.mulf %157, %159 : vector<8x8xf32>
    %161 = arith.truncf %160 : vector<8x8xf32> to vector<8x8xbf16>
    %c24 = arith.constant 24 : index
    %c0_47 = arith.constant 0 : index
    %162 = vector.load %arg4[%c24, %c0_47] : memref<32x128xbf16, #tpu.memory_space<vmem>>, vector<8x128xbf16>
    %cst_48 = arith.constant dense<0.000000e+00> : vector<8x128xf32>
    %163 = tpu.matmul %161, %162, %cst_48 {dimension_numbers = #tpu.dot_dimension_numbers<[1], [0], [0], [1], [0, 0, 1, 1], [], []>} : vector<8x8xbf16>, vector<8x128xbf16>, vector<8x128xf32> -> vector<8x128xf32>
    %164 = arith.addf %125, %163 : vector<8x128xf32>
    %165 = vector.broadcast %7 : vector<1x128xf32> to vector<8x128xf32>
    %166 = arith.addf %164, %165 : vector<8x128xf32>
    %c0_49 = arith.constant 0 : index
    %c0_50 = arith.constant 0 : index
    %167 = vector.load %arg6[%c0_49, %c0_50] : memref<8x128xf32, #tpu.memory_space<vmem>>, vector<8x128xf32>
    tpu.vector_store %arg6[%c0_49, %c0_50], %166 {strides = array<i32>} : memref<8x128xf32, #tpu.memory_space<vmem>>, vector<8x128xf32>,
    return
  }
  func.func @transform_0(%arg0: i32) -> (i32, i32) {
    %c0_i32 = arith.constant 0 : i32
    %c0_i32_0 = arith.constant 0 : i32
    return %arg0, %c0_i32 : i32, i32
  }
  func.func @transform_1(%arg0: i32) -> (i32, i32) {
    %c0_i32 = arith.constant 0 : i32
    %c0_i32_0 = arith.constant 0 : i32
    %c0_i32_1 = arith.constant 0 : i32
    return %c0_i32, %c0_i32_0 : i32, i32
  }
  func.func @transform_2(%arg0: i32) -> (i32, i32) {
    %c0_i32 = arith.constant 0 : i32
    %c0_i32_0 = arith.constant 0 : i32
    %c0_i32_1 = arith.constant 0 : i32
    return %c0_i32, %c0_i32_0 : i32, i32
  }
  func.func @transform_3(%arg0: i32) -> (i32, i32) {
    %c0_i32 = arith.constant 0 : i32
    %c0_i32_0 = arith.constant 0 : i32
    %c0_i32_1 = arith.constant 0 : i32
    return %c0_i32, %c0_i32_0 : i32, i32
  }
  func.func @transform_4(%arg0: i32) -> (i32, i32) {
    %c0_i32 = arith.constant 0 : i32
    %c0_i32_0 = arith.constant 0 : i32
    %c0_i32_1 = arith.constant 0 : i32
    return %c0_i32, %c0_i32_0 : i32, i32
  }
  func.func @transform_5(%arg0: i32) -> (i32, i32) {
    %c0_i32 = arith.constant 0 : i32
    %c0_i32_0 = arith.constant 0 : i32
    return %arg0, %c0_i32 : i32, i32
  }
}

</mosaic_0001>

<bundles_post_ra>
// kernel: tpu_custom_call.1
= control target key start
LH: loop header
LB: loop body
LE: loop exit
PB: predicated region body
PF: predicated region fallthrough
CT: control target
= control target key end

     0   :  { %10 = vsyncpa [#allocation3], 0  ;;  %s1921_s0 = inlined_call_operand.hbm [shape: f32[16,32], index: 0, kind: input, shape index: {}]   ;;  %s1922_s1 = inlined_call_operand.hbm [shape: bf16[32,96], index: 1, kind: input, shape index: {}]   ;;  %s1923_s2 = inlined_call_operand.vmem [shape: f32[1,96], index: 2, kind: input, shape index: {}]   ;;  %s1924_s3 = inlined_call_operand.hbm [shape: bf16[32,128], index: 3, kind: input, shape index: {}]   ;;  %s1925_s4 = inlined_call_operand.vmem [shape: f32[1,128], index: 4, kind: input, shape index: {}]   ;;  %s1926_s5 = inlined_call_operand.hbm [shape: f32[16,128], index: 5, kind: output, shape index: {}]  }
   0x1   :  { %12 = vsyncpa [#allocation3 + $0x1], 0 }
   0x2   :  { %13 = vsyncpa [#allocation6], 0 }
   0x3   :  { %14 = vsyncpa [#allocation4], 0 }
   0x4   :  { %16 = vsyncpa [#allocation4 + $0x1], 0  ;;  %s1575_s18 = smov 0   ;;  %s1577_s19 = smov 0  }
   0x5   :  { %s1579_s20 = smov 0   ;;  %s1581_s21 = smov 0  }
   0x6 LB: > { %s1596_s22 = sadd.s32 4294967295, %s1524_s21   ;;  %s1120_s23 = sadd.s32 4294967294, %s1524_s21   ;;  %s1524_s21 = sphi %s1581_s21, %s1946_s21   ;;  %s1520_s20 = sphi %s1579_s20, %s1945_s20   ;;  %s1516_s19 = sphi %s1577_s19, %s1944_s19   ;;  %s1512_s18 = sphi %s1575_s18, %s1943_s18  }
   0x7   : > { %p42_p0 = scmp.ne.s32.totalorder %s1516_s19, %s1512_s18  ;;  %p1927_p1 = scmp.eq.s32.totalorder %s1596_s22, 0 }
   0x8   : > { %p156_p3 = scmp.eq.s32.totalorder %s1120_s23, 1  ;;  %p1121_p5 = scmp.ge.s32.totalorder %s1524_s21, 1 }
   0x9   : > { %p1605_p4 = por %p1927_p1, %p42_p0  ;;  %p163_p7 = scmp.lt.s32.totalorder %s1524_s21, 3 }
   0xa   : > { %p1610_p6 = por %p156_p3, %p42_p0  ;;  %s1526_s27 = smov [#allocation5]  }
   0xb   : > { %s1930_s24 = scalar_select %p1605_p4, 1, 0 }
   0xc   : > { %s1931_s25 = scalar_select %p1610_p6, 1, 0 }
   0xd   : > { %p1615_p8 = pnand %p1121_p5, %p163_p7  ;;  %s175_s28 = sshll.u32 %s1526_s27, 4  ;;  %s1619_s28 = int_to_ptr.vmem [resolvable:$true] %s175_s28 }
   0xe   : > { %s1527_s30 = smov [#allocation7]   ;;  %s1368_s9 = scalar_lea.hbm %s1922_s1, 256 }
   0xf   : > { %p1272_p9 = pneg %p1615_p8  ;;  %s191_s6 = sshll.u32 %s1527_s30, 4  ;;  %s1630_s6 = int_to_ptr.vmem [resolvable:$true] %s191_s6 }
  0x10   : > { %p1369_p12 = scmp.ne.s32.totalorder %s1922_s1, %s1368_s9  ;;  %p1375_p5 = scmp.lt.u32.totalorder %s1368_s9, %s1922_s1 }
  0x11   : > { %p1626_p11 = pnand %p1272_p9, %p1927_p1 }
  0x13   : > { %p1370_p13 = pneg %p1626_p11 }
  0x15   : > { %p1371_p0 = pnand %p1370_p13, %p1369_p12 }
  0x17   : > { %p1372_p3 = pneg %p1371_p0 }
  0x19   : > { %p1377_p7 = pnand %p1375_p5, %p1372_p3 }
  0x1b   : > { %1380 = shalt.err (!%p1377_p7)
}
  0x1c   : > { %s1381_s14 = scalar_lea.vmem %s1619_s28, 256  ;;  %p1389_p2 = scmp.lt.s32.totalorder %s1619_s28, %s1619_s28 }
  0x1d   : > { %p1382_p9 = scmp.ne.s32.totalorder %s1619_s28, %s1381_s14  ;;  %p1390_p12 = scmp.lt.s32.totalorder %s1381_s14, %s1381_s14 }
  0x1f   : > { %p1384_p10 = pnand %p1382_p9, %p1370_p13  ;;  %p1391_p0 = por %p1390_p12, %p1389_p2 }
  0x21   : > { %p1385_p1 = pneg %p1384_p10 }
  0x23   : > { %p1392_p6 = pnand %p1391_p0, %p1385_p1 }
  0x25   : > { %1395 = shalt.err (!%p1392_p6)
}
  0x26   : > { %s1528_s15 = smov 64   ;;  %s1529_s16 = smov 4  }
  0x27   : > { %1275 = dma.hbm_to_vmem [thread:$0]  (!%p1626_p11), %s1922_s1, 256, %s1619_s28, [#allocation6], %s1528_s15, %s1528_s15, %s1529_s16  }
  0x28   : > { %s1396_s7 = scalar_lea.hbm %s1924_s3, 256 }
  0x29   : > { %p1397_p2 = scmp.ne.s32.totalorder %s1924_s3, %s1396_s7  ;;  %p1403_p10 = scmp.lt.u32.totalorder %s1396_s7, %s1924_s3 }
  0x2b   : > { %p1399_p1 = pnand %p1397_p2, %p1370_p13 }
  0x2d   : > { %p1400_p6 = pneg %p1399_p1 }
  0x2f   : > { %p1405_p3 = pnand %p1403_p10, %p1400_p6 }
  0x31   : > { %1408 = shalt.err (!%p1405_p3)
}
  0x32   : > { %s1409_s28 = scalar_lea.vmem %s1630_s6, 256  ;;  %p1417_p12 = scmp.lt.s32.totalorder %s1630_s6, %s1630_s6 }
  0x33   : > { %p1410_p5 = scmp.ne.s32.totalorder %s1630_s6, %s1409_s28  ;;  %p1418_p0 = scmp.lt.s32.totalorder %s1409_s28, %s1409_s28 }
  0x35   : > { %p1412_p7 = pnand %p1410_p5, %p1370_p13  ;;  %p1419_p2 = por %p1418_p0, %p1417_p12 }
  0x37   : > { %p1413_p9 = pneg %p1412_p7 }
  0x39   : > { %p1420_p1 = pnand %p1419_p2, %p1413_p9 }
  0x3b   : > { %1423 = shalt.err (!%p1420_p1)
}
  0x3c   : > { %1278 = dma.hbm_to_vmem [thread:$0]  (!%p1626_p11), %s1924_s3, 256, %s1630_s6, [#allocation6], %s1528_s15, %s1528_s15, %s1529_s16  }
  0x3d   : > { %s1685_s14 = sadd.s32 1, %s1524_s21   ;;  %s29_s29 = sadd.s32 1, %s1520_s20 }
  0x3e   : > { %s26_s17 = ssub.s32 %s1524_s21, %s1685_s14  ;;  %p36_p13 = scmp.ne.s32.totalorder %s1520_s20, %s1516_s19 }
  0x3f   : > { %p27_p6 = scmp.eq.s32.totalorder %s26_s17, 0  ;;  %p37_p10 = scmp.eq.s32.totalorder %s1524_s21, 0 }
  0x40   : > { %p1934_p3 = scmp.eq.s32.totalorder %s1596_s22, 1  ;;  %p1289_p7 = scmp.lt.s32.totalorder %s1524_s21, 2 }
  0x41   : > { %s1701_s27 = scalar_select %p27_p6, %s1520_s20, %s29_s29  }
  0x42   : > { %p1695_p5 = por %p1934_p3, %p36_p13  ;;  %p38_p9 = por %p37_p10, %p36_p13 }
  0x43   : > { %s208_s30 = sand.u32 1, %s1520_s20   ;;  %s1126_s6 = sshll.u32 %s1524_s21, 7 }
  0x44   : > { %s1935_s23 = scalar_select %p1695_p5, 1, 0 }
  0x45   : > { %s1125_s7 = sshll.u32 %s208_s30, 3  ;;  %s1708_s8 = scalar_lea.hbm %s1921_s0, %s1126_s6 }
  0x46   : > { %s212_s9 = scalar_lea.vmem [#allocation2], %s1125_s7  ;;  %p1712_p11 = pnand %p1289_p7, %p38_p9 }
  0x47   : > { %s219_s10 = sshll.u32 %s212_s9, 4  ;;  %s209_s28 = scalar_lea.sflag [#allocation3], %s208_s30  ;;  %s1710_s10 = int_to_ptr.vmem [resolvable:$true] %s219_s10 }
  0x48   : > { %s1424_s12 = scalar_lea.hbm %s1708_s8, 128  ;;  %p1426_p0 = pneg %p1712_p11 }
  0x49   : > { %p1425_p12 = scmp.ne.s32.totalorder %s1708_s8, %s1424_s12  ;;  %s1429_s17 = scalar_lea.hbm %s1921_s0, 256 }
  0x4a   : > { %p1430_p13 = scmp.lt.u32.totalorder %s1708_s8, %s1921_s0  ;;  %p1431_p6 = scmp.lt.u32.totalorder %s1429_s17, %s1424_s12 }
  0x4b   : > { %p1427_p2 = pnand %p1426_p0, %p1425_p12  ;;  %p1433_p3 = scmp.lt.u32.totalorder %s1424_s12, %s1708_s8 }
  0x4c   : > { %p1432_p10 = por %p1431_p6, %p1430_p13 }
  0x4d   : > { %p1428_p1 = pneg %p1427_p2 }
  0x4e   : > { %p1434_p7 = por %p1433_p3, %p1432_p10 }
  0x50   : > { %p1435_p9 = pnand %p1434_p7, %p1428_p1 }
  0x52   : > { %1438 = shalt.err (!%p1435_p9)
}
  0x53   : > { %s1439_s30 = scalar_lea.vmem %s1710_s10, 128  ;;  %s1530_s15 = smov [#allocation2]  }
  0x54   : > { %p1440_p12 = scmp.ne.s32.totalorder %s1710_s10, %s1439_s30  ;;  %s1444_s16 = sshll.u32 %s1530_s15, 4  ;;  %s1445_s16 = int_to_ptr.vmem [resolvable:$false] %s1444_s16 }
  0x55   : > { %s1446_s9 = scalar_lea.vmem %s1445_s16, 256  ;;  %p1447_p4 = scmp.lt.s32.totalorder %s1710_s10, %s1445_s16 }
  0x56   : > { %p1442_p2 = pnand %p1440_p12, %p1426_p0  ;;  %p1448_p13 = scmp.lt.s32.totalorder %s1446_s9, %s1439_s30 }
  0x58   : > { %p1443_p5 = pneg %p1442_p2  ;;  %p1449_p6 = por %p1448_p13, %p1447_p4 }
  0x5a   : > { %p1450_p10 = pnand %p1449_p6, %p1443_p5 }
  0x5c   : > { %1453 = shalt.err (!%p1450_p10)
}
  0x5d   : > { %1282 = dma.hbm_to_vmem [thread:$0]  (!%p1712_p11), %s1708_s8, 128, %s1710_s10, %s209_s28  }
  0x5e   : > { %228 = sbr.rel (%p1615_p8) target bundleno = 2263 (0x8d7), region = 40  ;;  %s1744_s12 = sand.u32 (!%p1615_p8), 1, %s1516_s19  }
  0x5f   : > { %s1128_s13 = sshll.u32 (!%p1615_p8), %s1744_s12, 3  ;;  %s231_s29 = scalar_lea.sflag (!%p1615_p8), [#allocation3], %s1744_s12 }
  0x60   : > { %s234_s17 = scalar_lea.vmem (!%p1615_p8), [#allocation2], %s1128_s13  ;;  %p1937_p4 = scmp.ne.s32.totalorder (!%p1615_p8), %s1930_s24, 0 }
  0x65   : > { %1499 = dma.done.wait (%p1937_p4), %s231_s29, 128  }
  0x66   : > { %1501 = vsyncadd (%p1937_p4), %s231_s29, 4294967168  ;;  %p1938_p5 = scmp.eq.s32.totalorder %s1596_s22, 0 }
  0x68   : > { %1503 = dma.done.wait (%p1938_p5), [#allocation6], 512   ;;  %p1939_p8 = pmov %p1938_p5 }
  0x69   : > { %v1531_v0 = vmov 0.0   ;;  %vm1532_vm0 = vmmov 0   ;;  %v1342_v1 = vld [vmem:[#allocation5] sm:$0xff]   ;;  %v1343_v2 = vld [vmem:[#allocation5 + $0x8] sm:$0xff]   ;;  %v270_v3 = vld [vmem:[%s234_s17] sm:$0xff]  ;;  %vm295_vm1 = vcmask 261120   ;;  %v391_v17 = vlaneseq }
  0x6a   : > { %1505 = vsyncadd (%p1939_p8), [#allocation6], 4294966784  ;;  %1180 = vmatprep.subr.bf16.mxu0 %v1531_v0  ;;  %1184 = vmatprep.mubr.msk.bf16.mxu0 %vm1532_vm0, %v1531_v0  ;;  %v271_v4 = vpack.c.bf16 %v270_v3, %v270_v3  ;;  %v1132_v5 = vld [vmem:[%s1923_s2] ss:$0 sm:$0xff]  ;;  %s1533_s8 = smov 120   ;;  %s1534_s10 = smov 96  }
  0x6b   : > { %1188 = vmatprep.subr.bf16.mxu1 %v1531_v0  ;;  %1190 = vmatprep.mubr.msk.bf16.mxu1 %vm1532_vm0, %v1531_v0  ;;  %s1535_s11 = smov 88   ;;  %vm344_vm2 = vcmask 64512   ;;  %v1787_v18 = vshrl.u32 %v391_v17, 7  ;;  %v1789_v19 = vand.u32 127, %v391_v17  ;;  %s1536_s28 = smov 56   ;;  %vm417_vm4 = vcmask 1043456  }
  0x6c   : > { %1181 = vmatpush3.bf16.msra.mxu0 %v1342_v1  ;;  %s1537_s7 = smov 64   ;;  %s1538_s6 = smov 80   ;;  %v465_v48 = vld [vmem:[#allocation7] sm:$0xf]  ;;  %v584_v50 = vld [vmem:[#allocation7 + $0x4] sm:$0xf] }
  0x6d   : > { %1182 = vmatprep.subr.bf16.mxu0 %v1531_v0  ;;  %vm395_vm3 = vcmp.ge.s32.totalorder %v1787_v18, %v1789_v19  ;;  %s1539_s30 = smov 112   ;;  %s1540_s15 = smov 72   ;;  %v635_v49 = vsel %vm417_vm4, %v465_v48, 0  ;;  %v589_v51 = vsel %vm417_vm4, %v584_v50, 0 }
  0x6e   : > { %s1541_s16 = smov 48   ;;  %s1542_s9 = smov 104  }
  0x6f   : > { %s1543_s29 = smov 40   ;;  %s1150_s26 = sshll.u32 %s1596_s22, 7 }
  0x70   : > { %1183 = vmatpush3.bf16.msra.mxu0 %v1343_v2  ;;  %s1018_s22 = scalar_lea.sflag [#allocation4], %s1744_s12  ;;  %p1940_p0 = scmp.ne.s32.totalorder %s1935_s23, 0 }
  0x71   : > { %1194 = vmatprep.subr.bf16.mxu0 %v1531_v0 }
  0x73   : > { %1185 = vmatmul.mubr.msk.bf16.vlgmr.msra.gmra.mrb[0].mxu0 %vm295_vm1, %v271_v4 }
  0x74   : > { %1196 = vmatprep.mubr.msk.bf16.mxu0 %vm1532_vm0, %v1531_v0 }
 0x146   : > { %v333_v6 = vpop.f32.mrb[0].mxu0 }
 0x147   : > { %v334_v7 = vadd.f32 %v1132_v5, %v333_v6  ;;  %v1186_v8 = vpop.f32.mrb[1].mxu0 }
 0x148   : > { %v336_v9 = vpop.f32.mrb[2].mxu0 }
 0x149   : > { %v1771_v10 = vpack.c.bf16 %v334_v7, %v334_v7  ;;  %v1187_v11 = vpop.f32.mrb[3].mxu0 }
 0x14b   : > { %466 = vrot.lane.b32.xlu1 %v1771_v10, %s1533_s8  ;;  %342 = vrot.lane.b32.xlu0 %v1771_v10, %s1534_s10  ;;  %s268_s8 = scalar_lea.vmem [#allocation8], %s1128_s13  ;;  %s1544_s13 = smov [#allocation8]  }
 0x14c   : > { %s1031_s10 = sshll.u32 %s268_s8, 4  ;;  %s1879_s10 = int_to_ptr.vmem [resolvable:$true] %s1031_s10 }
 0x14f   : > { %468 = vrot.lane.b32.xlu0 %v1771_v10, %s1535_s11 }
 0x1bd   : > { %v343_v12 = vpop.permute.xlu0 %342  ;;  %v467_v16 = vpop.permute.xlu1 %466 }
 0x1be   : > { %v349_v13 = vsel %vm344_vm2, %v343_v12, 0 }
 0x1bf   : > { %1189 = vmatpush3.bf16.xpose.msra.mxu1 %v349_v13 }
 0x1c0   : > { %1200 = vmatprep.subr.bf16.mxu1 %v1531_v0 }
 0x1c1   : > { %v469_v14 = vpop.permute.xlu0 %468 }
 0x1c2   : > { %v474_v15 = vsel %vm344_vm2, %v469_v14, 0 }
 0x1c6   : > { %1191 = vmatmul.mubr.msk.bf16.vlgmr.msra.gmra.mrb[0].mxu1 %vm344_vm2, %v1771_v10 }
 0x1c7   : > { %1201 = vmatpush3.bf16.xpose.msra.mxu1 %v474_v15  ;;  %1202 = vmatprep.mubr.msk.bf16.mxu1 %vm1532_vm0, %v1531_v0 }
 0x1c8   : > { %1212 = vmatprep.subr.bf16.mxu1 %v1531_v0 }
 0x1ce   : > { %1203 = vmatmul.mubr.msk.bf16.vlgmr.msra.gmra.mrb[4].mxu1 %vm344_vm2, %v467_v16 }
 0x1cf   : > { %1214 = vmatprep.mubr.msk.bf16.mxu1 %vm1532_vm0, %v1531_v0  ;;  %1213 = vmatpush3.bf16.msra.mxu1 %v589_v51 }
 0x1d0   : > { %1224 = vmatprep.subr.bf16.mxu1 %v1531_v0 }
 0x299   : > { %v385_v20 = vpop.f32.mrb[0].mxu1 }
 0x29a   : > { %v396_v21 = vsel %vm395_vm3, %v385_v20, -1e+30  ;;  %v1192_v22 = vpop.f32.mrb[1].mxu1 }
 0x29b   : > { %v388_v23 = vpop.f32.mrb[2].mxu1  ;;  %v397_v24 = vsel %vm344_vm2, %v396_v21, -inf }
 0x29c   : > { %398 = vmax.xlane.f32.xlu1 %v397_v24  ;;  %v1193_v25 = vpop.f32.mrb[3].mxu1 }
 0x2a1   : > { %v510_v26 = vpop.f32.mrb[4].mxu1 }
 0x2a2   : > { %v516_v27 = vsel %vm395_vm3, %v510_v26, -1e+30  ;;  %v1204_v28 = vpop.f32.mrb[5].mxu1 }
 0x2a3   : > { %v513_v29 = vpop.f32.mrb[6].mxu1  ;;  %v517_v30 = vsel %vm344_vm2, %v516_v27, -inf }
 0x2a4   : > { %518 = vmax.xlane.f32.xlu0 %v517_v30  ;;  %v1205_v31 = vpop.f32.mrb[7].mxu1 }
 0x2ad   : > { %532 = vrot.lane.b32.xlu1 %v1771_v10, %s1536_s28 }
 0x2ba   : > { %412 = vrot.lane.b32.xlu0 %v1771_v10, %s1537_s7  ;;  %s1877_s7 = scalar_lea.hbm %s1926_s5, %s1150_s26 }
 0x2be   : > { %679 = vrot.lane.b32.xlu0 %v1771_v10, %s1538_s6  ;;  %s1454_s6 = scalar_lea.vmem %s1879_s10, 128 }
 0x2bf   : > { %p1455_p11 = scmp.ne.s32.totalorder %s1879_s10, %s1454_s6 }
 0x2c1   : > { %p1456_p1 = pnand %p1455_p11, %p1940_p0 }
 0x2c2   : > { %677 = vrot.lane.b32.xlu0 %v1771_v10, %s1539_s30  ;;  %s1458_s30 = sshll.u32 %s1544_s13, 4  ;;  %s1459_s30 = int_to_ptr.vmem [resolvable:$false] %s1458_s30 }
 0x2c3   : > { %p1457_p3 = pneg %p1456_p1  ;;  %p1461_p7 = scmp.lt.s32.totalorder %s1879_s10, %s1459_s30 }
 0x329   : > { %v399_v32 = vpop.xlane.xlu1 %398 }
 0x32a   : > { %v403_v33 = vsub.f32 %v396_v21, %v399_v32  ;;  %v400_v52 = vsub.f32 -inf, %v399_v32 }
 0x32c   : > { %v404_v34 = vmul.f32 1.442695, %v403_v33  ;;  %v401_v53 = vmul.f32 1.442695, %v400_v52 }
 0x32d   : > { %v533_v41 = vpop.permute.xlu1 %532 }
 0x32e   : > { %1344 = vpow2.f32 %v404_v34  ;;  %v538_v44 = vsel %vm417_vm4, %v533_v41, 0 }
 0x331   : > { %v519_v35 = vpop.xlane.xlu0 %518 }
 0x332   : > { %v523_v36 = vsub.f32 %v516_v27, %v519_v35  ;;  %v520_v54 = vsub.f32 -inf, %v519_v35 }
 0x334   : > { %v524_v37 = vmul.f32 1.442695, %v523_v36  ;;  %v521_v56 = vmul.f32 1.442695, %v520_v54 }
 0x335   : > { %v413_v38 = vpop.permute.xlu0 %412 }
 0x336   : > { %v419_v39 = vsel %vm417_vm4, %v413_v38, 0  ;;  %1346 = vpow2.f32 %v524_v37 }
 0x337   : > { %1195 = vmatpush3.bf16.msra.mxu0 %v419_v39  ;;  %1348 = vpow2.f32 %v401_v53 }
 0x338   : > { %1206 = vmatprep.subr.bf16.mxu0 %v1531_v0  ;;  %v1345_v40 = vpop.eup %1344  ;;  %1350 = vpow2.f32 %v521_v56 }
 0x339   : > { %v407_v42 = vsel %vm344_vm2, %v1345_v40, 0.0  ;;  %v411_v43 = vpack.c.bf16 %v1345_v40, %v1345_v40  ;;  %v680_v55 = vpop.permute.xlu0 %679 }
 0x33a   : > { %408 = vadd.xlane.f32.xlu0 %v407_v42  ;;  %v685_v22 = vsel %vm344_vm2, %v680_v55, 0 }
 0x33b   : > { %1197 = vmatmul.mubr.msk.bf16.vlgmr.msra.gmra.mrb[4].mxu0 %vm344_vm2, %v411_v43 }
 0x33c   : > { %1207 = vmatpush3.bf16.msra.mxu0 %v538_v44  ;;  %1208 = vmatprep.mubr.msk.bf16.mxu0 %vm1532_vm0, %v1531_v0 }
 0x33d   : > { %1218 = vmatprep.subr.bf16.mxu0 %v1531_v0  ;;  %v678_v57 = vpop.permute.xlu0 %677 }
 0x340   : > { %v1347_v45 = vpop.eup %1346 }
 0x341   : > { %v527_v46 = vsel %vm344_vm2, %v1347_v45, 0.0  ;;  %v531_v47 = vpack.c.bf16 %v1347_v45, %v1347_v45  ;;  %v1349_v58 = vpop.eup %1348 }
 0x342   : > { %528 = vadd.xlane.f32.xlu1 %v527_v46  ;;  %v406_v60 = vmul.f32 0.0, %v1349_v58  ;;  %v1351_v62 = vpop.eup %1350 }
 0x343   : > { %1209 = vmatmul.mubr.msk.bf16.vlgmr.msra.gmra.mrb[8].mxu0 %vm344_vm2, %v531_v47  ;;  %v526_v1 = vmul.f32 0.0, %v1351_v62 }
 0x344   : > { %1220 = vmatprep.mubr.msk.bf16.mxu0 %vm1532_vm0, %v1531_v0  ;;  %1219 = vmatpush3.bf16.msra.mxu0 %v635_v49  ;;  %v795_v49 = vld [vmem:[#allocation7 + $0x8] sm:$0xf] }
 0x345   : > { %1230 = vmatprep.subr.bf16.mxu0 %v1531_v0  ;;  %v800_v50 = vsel %vm417_vm4, %v795_v49, 0 }
 0x350   : > { %845 = vrot.lane.b32.xlu0 %v1771_v10, %s1540_s15  ;;  %s1460_s15 = scalar_lea.vmem %s1459_s30, 256 }
 0x351   : > { %p1462_p9 = scmp.lt.s32.totalorder %s1460_s15, %s1454_s6 }
 0x353   : > { %p1463_p12 = por %p1462_p9, %p1461_p7 }
 0x355   : > { %p1464_p2 = pnand %p1463_p12, %p1457_p3 }
 0x3c7   : > { %v409_v59 = vpop.xlane.xlu0 %408 }
 0x3c8   : > { %v410_v61 = vadd.f32 %v409_v59, %v406_v60 }
 0x3ca   : > { %1352 = vrcp.f32 %v410_v61 }
 0x3cb   : > { %v846_v44 = vpop.permute.xlu0 %845 }
 0x3cc   : > { %v851_v47 = vsel %vm344_vm2, %v846_v44, 0 }
 0x3cf   : > { %v529_v63 = vpop.xlane.xlu1 %528 }
 0x3d0   : > { %v530_v2 = vadd.f32 %v529_v63, %v526_v1 }
 0x3d2   : > { %1354 = vrcp.f32 %v530_v2 }
 0x3d4   : > { %v1353_v6 = vpop.eup %1352 }
 0x3dc   : > { %v1355_v15 = vpop.eup %1354 }
 0x40e   : > { %v455_v3 = vpop.f32.mrb[4].mxu0 }
 0x40f   : > { %v461_v4 = vadd.f32 %v455_v3, %v406_v60  ;;  %v1198_v5 = vpop.f32.mrb[5].mxu0 }
 0x410   : > { %v458_v7 = vpop.f32.mrb[6].mxu0 }
 0x411   : > { %v463_v8 = vmul.f32 %v1353_v6, %v461_v4  ;;  %v1199_v9 = vpop.f32.mrb[7].mxu0 }
 0x413   : > { %v464_v11 = vpack.c.bf16 %v463_v8, %v463_v8 }
 0x415   : > { %1221 = vmatmul.mubr.msk.bf16.vlgmr.msra.gmra.mrb[12].mxu0 %vm344_vm2, %v464_v11 }
 0x416   : > { %v574_v12 = vpop.f32.mrb[8].mxu0  ;;  %1232 = vmatprep.mubr.msk.bf16.mxu0 %vm1532_vm0, %v1531_v0 }
 0x417   : > { %v580_v13 = vadd.f32 %v574_v12, %v526_v1  ;;  %v1210_v14 = vpop.f32.mrb[9].mxu0 }
 0x418   : > { %v577_v16 = vpop.f32.mrb[10].mxu0 }
 0x419   : > { %v582_v17 = vmul.f32 %v1355_v15, %v580_v13  ;;  %v1211_v20 = vpop.f32.mrb[11].mxu0 }
 0x41a   : > { %v961_v20 = vld [vmem:[#allocation7 + $0xc] sm:$0xf] }
 0x41b   : > { %v583_v21 = vpack.c.bf16 %v582_v17, %v582_v17 }
 0x41d   : > { %1215 = vmatmul.mubr.msk.bf16.vlgmr.msra.gmra.mrb[8].mxu1 %vm344_vm2, %v583_v21  ;;  %v966_v21 = vsel %vm417_vm4, %v961_v20, 0 }
 0x41e   : > { %1225 = vmatpush3.bf16.xpose.msra.mxu1 %v685_v22  ;;  %1226 = vmatprep.mubr.msk.bf16.mxu1 %vm1532_vm0, %v1531_v0 }
 0x41f   : > { %1236 = vmatprep.subr.bf16.mxu1 %v1531_v0 }
 0x425   : > { %1227 = vmatmul.mubr.msk.bf16.vlgmr.msra.gmra.mrb[12].mxu1 %vm344_vm2, %v678_v57 }
 0x426   : > { %1238 = vmatprep.mubr.msk.bf16.mxu1 %vm1532_vm0, %v1531_v0  ;;  %1237 = vmatpush3.bf16.msra.mxu1 %v800_v50 }
 0x427   : > { %1248 = vmatprep.subr.bf16.mxu1 %v1531_v0 }
 0x4e8   : > { %v671_v23 = vpop.f32.mrb[12].mxu0 }
 0x4e9   : > { %v1222_v24 = vpop.f32.mrb[13].mxu0 }
 0x4ea   : > { %v674_v25 = vpop.f32.mrb[14].mxu0 }
 0x4eb   : > { %v1223_v26 = vpop.f32.mrb[15].mxu0 }
 0x4f0   : > { %v625_v27 = vpop.f32.mrb[8].mxu1 }
 0x4f1   : > { %v1833_v28 = vadd.f32 %v671_v23, %v625_v27  ;;  %v1216_v29 = vpop.f32.mrb[9].mxu1 }
 0x4f2   : > { %v628_v30 = vpop.f32.mrb[10].mxu1 }
 0x4f3   : > { %v1217_v31 = vpop.f32.mrb[11].mxu1 }
 0x4f8   : > { %v721_v32 = vpop.f32.mrb[12].mxu1 }
 0x4f9   : > { %v727_v33 = vsel %vm395_vm3, %v721_v32, -1e+30  ;;  %v1228_v34 = vpop.f32.mrb[13].mxu1 }
 0x4fa   : > { %v724_v35 = vpop.f32.mrb[14].mxu1  ;;  %v728_v36 = vsel %vm344_vm2, %v727_v33, -inf }
 0x4fb   : > { %729 = vmax.xlane.f32.xlu1 %v728_v36  ;;  %v1229_v37 = vpop.f32.mrb[15].mxu1  ;;  %v1148_v36 = vld [vmem:[%s1925_s4] ss:$0 sm:$0xff] }
 0x50c   : > { %743 = vrot.lane.b32.xlu1 %v1771_v10, %s1541_s16 }
 0x510   : > { %843 = vrot.lane.b32.xlu1 %v1771_v10, %s1542_s9 }
 0x588   : > { %v730_v38 = vpop.xlane.xlu1 %729 }
 0x589   : > { %v734_v39 = vsub.f32 %v727_v33, %v730_v38  ;;  %v731_v51 = vsub.f32 -inf, %v730_v38 }
 0x58b   : > { %v735_v40 = vmul.f32 1.442695, %v734_v39  ;;  %v732_v52 = vmul.f32 1.442695, %v731_v51 }
 0x58c   : > { %v744_v41 = vpop.permute.xlu1 %743 }
 0x58d   : > { %v749_v42 = vsel %vm417_vm4, %v744_v41, 0  ;;  %1356 = vpow2.f32 %v735_v40 }
 0x58e   : > { %1231 = vmatpush3.bf16.msra.mxu0 %v749_v42  ;;  %1358 = vpow2.f32 %v732_v52 }
 0x58f   : > { %1242 = vmatprep.subr.bf16.mxu0 %v1531_v0 }
 0x590   : > { %v844_v48 = vpop.permute.xlu1 %843 }
 0x597   : > { %v1357_v43 = vpop.eup %1356 }
 0x598   : > { %v738_v45 = vsel %vm344_vm2, %v1357_v43, 0.0  ;;  %v742_v46 = vpack.c.bf16 %v1357_v43, %v1357_v43  ;;  %v1359_v53 = vpop.eup %1358 }
 0x599   : > { %739 = vadd.xlane.f32.xlu1 %v738_v45  ;;  %v737_v55 = vmul.f32 0.0, %v1359_v53 }
 0x59a   : > { %1233 = vmatmul.mubr.msk.bf16.vlgmr.msra.gmra.mrb[16].mxu0 %vm344_vm2, %v742_v46 }
 0x59b   : > { %1243 = vmatpush3.bf16.xpose.msra.mxu0 %v851_v47  ;;  %1244 = vmatprep.mubr.msk.bf16.mxu0 %vm1532_vm0, %v1531_v0 }
 0x59c   : > { %1254 = vmatprep.subr.bf16.mxu0 %v1531_v0 }
 0x5a2   : > { %1245 = vmatmul.mubr.msk.bf16.vlgmr.msra.gmra.mrb[20].mxu0 %vm344_vm2, %v844_v48 }
 0x5a3   : > { %1256 = vmatprep.mubr.msk.bf16.mxu0 %vm1532_vm0, %v1531_v0  ;;  %1255 = vmatpush3.bf16.msra.mxu0 %v966_v21 }
 0x626   : > { %v740_v54 = vpop.xlane.xlu1 %739 }
 0x627   : > { %v741_v56 = vadd.f32 %v740_v54, %v737_v55 }
 0x629   : > { %1360 = vrcp.f32 %v741_v56 }
 0x633   : > { %v1361_v60 = vpop.eup %1360 }
 0x66d   : > { %v785_v57 = vpop.f32.mrb[16].mxu0 }
 0x66e   : > { %v791_v58 = vadd.f32 %v785_v57, %v737_v55  ;;  %v1234_v59 = vpop.f32.mrb[17].mxu0 }
 0x66f   : > { %v788_v61 = vpop.f32.mrb[18].mxu0 }
 0x670   : > { %v793_v62 = vmul.f32 %v1361_v60, %v791_v58  ;;  %v1235_v63 = vpop.f32.mrb[19].mxu0 }
 0x672   : > { %v794_v1 = vpack.c.bf16 %v793_v62, %v793_v62 }
 0x674   : > { %1239 = vmatmul.mubr.msk.bf16.vlgmr.msra.gmra.mrb[16].mxu1 %vm344_vm2, %v794_v1 }
 0x675   : > { %v887_v2 = vpop.f32.mrb[20].mxu0  ;;  %1250 = vmatprep.mubr.msk.bf16.mxu1 %vm1532_vm0, %v1531_v0 }
 0x676   : > { %v893_v3 = vsel %vm395_vm3, %v887_v2, -1e+30  ;;  %v1246_v4 = vpop.f32.mrb[21].mxu0 }
 0x677   : > { %v890_v5 = vpop.f32.mrb[22].mxu0  ;;  %v894_v6 = vsel %vm344_vm2, %v893_v3, -inf }
 0x678   : > { %895 = vmax.xlane.f32.xlu0 %v894_v6  ;;  %v1247_v7 = vpop.f32.mrb[23].mxu0 }
 0x68e   : > { %909 = vrot.lane.b32.xlu0 %v1771_v10, %s1543_s29 }
 0x705   : > { %v896_v8 = vpop.xlane.xlu0 %895 }
 0x706   : > { %v900_v9 = vsub.f32 %v893_v3, %v896_v8  ;;  %v897_v22 = vsub.f32 -inf, %v896_v8 }
 0x708   : > { %v901_v11 = vmul.f32 1.442695, %v900_v9  ;;  %v898_v23 = vmul.f32 1.442695, %v897_v22 }
 0x709   : > { %v910_v12 = vpop.permute.xlu0 %909 }
 0x70a   : > { %v915_v13 = vsel %vm417_vm4, %v910_v12, 0  ;;  %1362 = vpow2.f32 %v901_v11 }
 0x70b   : > { %1249 = vmatpush3.bf16.msra.mxu1 %v915_v13  ;;  %1364 = vpow2.f32 %v898_v23 }
 0x714   : > { %v1363_v0 = vpop.eup %1362 }
 0x715   : > { %v904_v18 = vsel %vm344_vm2, %v1363_v0, 0.0  ;;  %v908_v19 = vpack.c.bf16 %v1363_v0, %v1363_v0  ;;  %v1365_v24 = vpop.eup %1364 }
 0x716   : > { %905 = vadd.xlane.f32.xlu1 %v904_v18  ;;  %v903_v26 = vmul.f32 0.0, %v1365_v24 }
 0x717   : > { %1251 = vmatmul.mubr.msk.bf16.vlgmr.msra.gmra.mrb[20].mxu1 %vm344_vm2, %v908_v19 }
 0x747   : > { %v836_v14 = vpop.f32.mrb[16].mxu1 }
 0x748   : > { %v842_v15 = vadd.f32 %v836_v14, %v1833_v28  ;;  %v1240_v16 = vpop.f32.mrb[17].mxu1 }
 0x749   : > { %v839_v10 = vpop.f32.mrb[18].mxu1 }
 0x74a   : > { %v1241_v17 = vpop.f32.mrb[19].mxu1 }
 0x7a3   : > { %v906_v25 = vpop.xlane.xlu1 %905 }
 0x7a4   : > { %v907_v27 = vadd.f32 %v906_v25, %v903_v26 }
 0x7a6   : > { %1366 = vrcp.f32 %v907_v27 }
 0x7b0   : > { %v1367_v31 = vpop.eup %1366 }
 0x7ea   : > { %v951_v29 = vpop.f32.mrb[20].mxu1 }
 0x7eb   : > { %v957_v30 = vadd.f32 %v951_v29, %v903_v26  ;;  %v1252_v28 = vpop.f32.mrb[21].mxu1 }
 0x7ec   : > { %v954_v32 = vpop.f32.mrb[22].mxu1 }
 0x7ed   : > { %v959_v33 = vmul.f32 %v1367_v31, %v957_v30  ;;  %v1253_v34 = vpop.f32.mrb[23].mxu1 }
 0x7ef   : > { %v960_v35 = vpack.c.bf16 %v959_v33, %v959_v33 }
 0x7f1   : > { %1257 = vmatmul.mubr.msk.bf16.vlgmr.msra.gmra.mrb[24].mxu0 %vm344_vm2, %v960_v35 }
 0x8c4   : > { %v1002_v37 = vpop.f32.mrb[24].mxu0 }
 0x8c5   : > { %v1008_v38 = vadd.f32 %v1002_v37, %v842_v15  ;;  %v1258_v39 = vpop.f32.mrb[25].mxu0 }
 0x8c6   : > { %v1005_v40 = vpop.f32.mrb[26].mxu0 }
 0x8c7   : > { %v1015_v41 = vadd.f32 %v1148_v36, %v1008_v38  ;;  %v1259_v42 = vpop.f32.mrb[27].mxu0 }
 0x8c9   : > { %1016 = vst [vmem:[%s268_s8] sm:$0xff] %v1015_v41 }
 0x8ca   : > { %1467 = shalt.err (!%p1464_p2)
}
 0x8cb   : > { %s1468_s12 = scalar_lea.hbm %s1877_s7, 128  ;;  %s1472_s29 = scalar_lea.hbm %s1926_s5, 256 }
 0x8cc   : > { %p1469_p13 = scmp.ne.s32.totalorder %s1877_s7, %s1468_s12  ;;  %p1473_p4 = scmp.lt.u32.totalorder %s1877_s7, %s1926_s5 }
 0x8cd   : > { %p1474_p5 = scmp.lt.u32.totalorder %s1472_s29, %s1468_s12  ;;  %p1476_p11 = scmp.lt.u32.totalorder %s1468_s12, %s1877_s7 }
 0x8ce   : > { %p1470_p6 = pnand %p1469_p13, %p1940_p0 }
 0x8cf   : > { %p1475_p8 = por %p1474_p5, %p1473_p4 }
 0x8d0   : > { %p1471_p10 = pneg %p1470_p6 }
 0x8d1   : > { %p1477_p1 = por %p1476_p11, %p1475_p8 }
 0x8d3   : > { %p1478_p3 = pnand %p1477_p1, %p1471_p10 }
 0x8d5   : > { %1481 = shalt.err (!%p1478_p3)
}
 0x8d6   : > { %1270 = dma.vmem_to_hbm [thread:$0]  (%p1940_p0), %s1879_s10, 128, %s1877_s7, %s1018_s22  }
 0x8d7 PF: > { %s1043_s26 = sand.u32 1, %s1512_s18   ;;  %p1941_p7 = scmp.ne.s32.totalorder %s1931_s25, 0 }
 0x8d8   : > { %p1942_p9 = scmp.ge.s32.totalorder %s1524_s21, 2  ;;  %s1044_s8 = scalar_lea.sflag [#allocation4], %s1043_s26 }
 0x8da   : > { %p1284_p12 = pnand %p1942_p9, %p1941_p7 }
 0x8dc   : > { %1507 = dma.done.wait (!%p1284_p12), %s1044_s8, 128  }
 0x8dd   : > { %1509 = vsyncadd (!%p1284_p12), %s1044_s8, 4294967168  ;;  %p19_p2 = scmp.ge.s32.totalorder %s1685_s14, 4   ;;  %s1943_s18 = smov %s1516_s19 }
 0x8de   : > { %s1944_s19 = smov %s1520_s20  ;;  %s1945_s20 = smov %s1701_s27 }
 0x8df   : > { %s1946_s21 = smov %s1685_s14  ;;  %21 = sbr.rel (!%p19_p2) target bundleno = 6 (0x6), region = 93 }
 0x8e6   :  { %1049 = vsyncpa [#allocation3], 1 }
 0x8e7   :  { %1051 = vsyncpa [#allocation3 + $0x1], 1 }
 0x8e8   :  { %1052 = vsyncpa [#allocation6], 1 }
 0x8e9   :  { %1053 = vsyncpa [#allocation4], 1 }
 0x8ea   :  { %1055 = vsyncpa [#allocation4 + $0x1], 1 }

// kernel: tpu_custom_call.1
= control target key start
LH: loop header
LB: loop body
LE: loop exit
PB: predicated region body
PF: predicated region fallthrough
CT: control target
= control target key end

     0   :  { %10 = vsyncpa [#allocation3], 0  ;;  %s1921_s0 = inlined_call_operand.hbm [shape: f32[16,32], index: 0, kind: input, shape index: {}]   ;;  %s1922_s1 = inlined_call_operand.hbm [shape: bf16[32,96], index: 1, kind: input, shape index: {}]   ;;  %s1923_s2 = inlined_call_operand.vmem [shape: f32[1,96], index: 2, kind: input, shape index: {}]   ;;  %s1924_s3 = inlined_call_operand.hbm [shape: bf16[32,128], index: 3, kind: input, shape index: {}]   ;;  %s1925_s4 = inlined_call_operand.vmem [shape: f32[1,128], index: 4, kind: input, shape index: {}]   ;;  %s1926_s5 = inlined_call_operand.hbm [shape: f32[16,128], index: 5, kind: output, shape index: {}]  }
   0x1   :  { %12 = vsyncpa [#allocation3 + $0x1], 0 }
   0x2   :  { %13 = vsyncpa [#allocation6], 0 }
   0x3   :  { %14 = vsyncpa [#allocation4], 0 }
   0x4   :  { %16 = vsyncpa [#allocation4 + $0x1], 0  ;;  %s1575_s18 = smov 0   ;;  %s1577_s19 = smov 0  }
   0x5   :  { %s1579_s20 = smov 0   ;;  %s1581_s21 = smov 0  }
   0x6 LB: > { %s1596_s22 = sadd.s32 4294967295, %s1524_s21   ;;  %s1120_s23 = sadd.s32 4294967294, %s1524_s21   ;;  %s1524_s21 = sphi %s1581_s21, %s1946_s21   ;;  %s1520_s20 = sphi %s1579_s20, %s1945_s20   ;;  %s1516_s19 = sphi %s1577_s19, %s1944_s19   ;;  %s1512_s18 = sphi %s1575_s18, %s1943_s18  }
   0x7   : > { %p42_p0 = scmp.ne.s32.totalorder %s1516_s19, %s1512_s18  ;;  %p1927_p1 = scmp.eq.s32.totalorder %s1596_s22, 0 }
   0x8   : > { %p156_p3 = scmp.eq.s32.totalorder %s1120_s23, 1  ;;  %p1121_p5 = scmp.ge.s32.totalorder %s1524_s21, 1 }
   0x9   : > { %p1605_p4 = por %p1927_p1, %p42_p0  ;;  %p163_p7 = scmp.lt.s32.totalorder %s1524_s21, 3 }
   0xa   : > { %p1610_p6 = por %p156_p3, %p42_p0  ;;  %s1526_s27 = smov [#allocation5]  }
   0xb   : > { %s1930_s24 = scalar_select %p1605_p4, 1, 0 }
   0xc   : > { %s1931_s25 = scalar_select %p1610_p6, 1, 0 }
   0xd   : > { %p1615_p8 = pnand %p1121_p5, %p163_p7  ;;  %s175_s28 = sshll.u32 %s1526_s27, 4  ;;  %s1619_s28 = int_to_ptr.vmem [resolvable:$true] %s175_s28 }
   0xe   : > { %s1527_s30 = smov [#allocation7]   ;;  %s1368_s9 = scalar_lea.hbm %s1922_s1, 256 }
   0xf   : > { %p1272_p9 = pneg %p1615_p8  ;;  %s191_s6 = sshll.u32 %s1527_s30, 4  ;;  %s1630_s6 = int_to_ptr.vmem [resolvable:$true] %s191_s6 }
  0x10   : > { %p1369_p12 = scmp.ne.s32.totalorder %s1922_s1, %s1368_s9  ;;  %p1375_p5 = scmp.lt.u32.totalorder %s1368_s9, %s1922_s1 }
  0x11   : > { %p1626_p11 = pnand %p1272_p9, %p1927_p1 }
  0x13   : > { %p1370_p13 = pneg %p1626_p11 }
  0x15   : > { %p1371_p0 = pnand %p1370_p13, %p1369_p12 }
  0x17   : > { %p1372_p3 = pneg %p1371_p0 }
  0x19   : > { %p1377_p7 = pnand %p1375_p5, %p1372_p3 }
  0x1b   : > { %1380 = shalt.err (!%p1377_p7)
}
  0x1c   : > { %s1381_s14 = scalar_lea.vmem %s1619_s28, 256  ;;  %p1389_p2 = scmp.lt.s32.totalorder %s1619_s28, %s1619_s28 }
  0x1d   : > { %p1382_p9 = scmp.ne.s32.totalorder %s1619_s28, %s1381_s14  ;;  %p1390_p12 = scmp.lt.s32.totalorder %s1381_s14, %s1381_s14 }
  0x1f   : > { %p1384_p10 = pnand %p1382_p9, %p1370_p13  ;;  %p1391_p0 = por %p1390_p12, %p1389_p2 }
  0x21   : > { %p1385_p1 = pneg %p1384_p10 }
  0x23   : > { %p1392_p6 = pnand %p1391_p0, %p1385_p1 }
  0x25   : > { %1395 = shalt.err (!%p1392_p6)
}
  0x26   : > { %s1528_s15 = smov 64   ;;  %s1529_s16 = smov 4  }
  0x27   : > { %1275 = dma.hbm_to_vmem [thread:$0]  (!%p1626_p11), %s1922_s1, 256, %s1619_s28, [#allocation6], %s1528_s15, %s1528_s15, %s1529_s16  }
  0x28   : > { %s1396_s7 = scalar_lea.hbm %s1924_s3, 256 }
  0x29   : > { %p1397_p2 = scmp.ne.s32.totalorder %s1924_s3, %s1396_s7  ;;  %p1403_p10 = scmp.lt.u32.totalorder %s1396_s7, %s1924_s3 }
  0x2b   : > { %p1399_p1 = pnand %p1397_p2, %p1370_p13 }
  0x2d   : > { %p1400_p6 = pneg %p1399_p1 }
  0x2f   : > { %p1405_p3 = pnand %p1403_p10, %p1400_p6 }
  0x31   : > { %1408 = shalt.err (!%p1405_p3)
}
  0x32   : > { %s1409_s28 = scalar_lea.vmem %s1630_s6, 256  ;;  %p1417_p12 = scmp.lt.s32.totalorder %s1630_s6, %s1630_s6 }
  0x33   : > { %p1410_p5 = scmp.ne.s32.totalorder %s1630_s6, %s1409_s28  ;;  %p1418_p0 = scmp.lt.s32.totalorder %s1409_s28, %s1409_s28 }
  0x35   : > { %p1412_p7 = pnand %p1410_p5, %p1370_p13  ;;  %p1419_p2 = por %p1418_p0, %p1417_p12 }
  0x37   : > { %p1413_p9 = pneg %p1412_p7 }
  0x39   : > { %p1420_p1 = pnand %p1419_p2, %p1413_p9 }
  0x3b   : > { %1423 = shalt.err (!%p1420_p1)
}
  0x3c   : > { %1278 = dma.hbm_to_vmem [thread:$0]  (!%p1626_p11), %s1924_s3, 256, %s1630_s6, [#allocation6], %s1528_s15, %s1528_s15, %s1529_s16  }
  0x3d   : > { %s1685_s14 = sadd.s32 1, %s1524_s21   ;;  %s29_s29 = sadd.s32 1, %s1520_s20 }
  0x3e   : > { %s26_s17 = ssub.s32 %s1524_s21, %s1685_s14  ;;  %p36_p13 = scmp.ne.s32.totalorder %s1520_s20, %s1516_s19 }
  0x3f   : > { %p27_p6 = scmp.eq.s32.totalorder %s26_s17, 0  ;;  %p37_p10 = scmp.eq.s32.totalorder %s1524_s21, 0 }
  0x40   : > { %p1934_p3 = scmp.eq.s32.totalorder %s1596_s22, 1  ;;  %p1289_p7 = scmp.lt.s32.totalorder %s1524_s21, 2 }
  0x41   : > { %s1701_s27 = scalar_select %p27_p6, %s1520_s20, %s29_s29  }
  0x42   : > { %p1695_p5 = por %p1934_p3, %p36_p13  ;;  %p38_p9 = por %p37_p10, %p36_p13 }
  0x43   : > { %s208_s30 = sand.u32 1, %s1520_s20   ;;  %s1126_s6 = sshll.u32 %s1524_s21, 7 }
  0x44   : > { %s1935_s23 = scalar_select %p1695_p5, 1, 0 }
  0x45   : > { %s1125_s7 = sshll.u32 %s208_s30, 3  ;;  %s1708_s8 = scalar_lea.hbm %s1921_s0, %s1126_s6 }
  0x46   : > { %s212_s9 = scalar_lea.vmem [#allocation2], %s1125_s7  ;;  %p1712_p11 = pnand %p1289_p7, %p38_p9 }
  0x47   : > { %s219_s10 = sshll.u32 %s212_s9, 4  ;;  %s209_s28 = scalar_lea.sflag [#allocation3], %s208_s30  ;;  %s1710_s10 = int_to_ptr.vmem [resolvable:$true] %s219_s10 }
  0x48   : > { %s1424_s12 = scalar_lea.hbm %s1708_s8, 128  ;;  %p1426_p0 = pneg %p1712_p11 }
  0x49   : > { %p1425_p12 = scmp.ne.s32.totalorder %s1708_s8, %s1424_s12  ;;  %s1429_s17 = scalar_lea.hbm %s1921_s0, 256 }
  0x4a   : > { %p1430_p13 = scmp.lt.u32.totalorder %s1708_s8, %s1921_s0  ;;  %p1431_p6 = scmp.lt.u32.totalorder %s1429_s17, %s1424_s12 }
  0x4b   : > { %p1427_p2 = pnand %p1426_p0, %p1425_p12  ;;  %p1433_p3 = scmp.lt.u32.totalorder %s1424_s12, %s1708_s8 }
  0x4c   : > { %p1432_p10 = por %p1431_p6, %p1430_p13 }
  0x4d   : > { %p1428_p1 = pneg %p1427_p2 }
  0x4e   : > { %p1434_p7 = por %p1433_p3, %p1432_p10 }
  0x50   : > { %p1435_p9 = pnand %p1434_p7, %p1428_p1 }
  0x52   : > { %1438 = shalt.err (!%p1435_p9)
}
  0x53   : > { %s1439_s30 = scalar_lea.vmem %s1710_s10, 128  ;;  %s1530_s15 = smov [#allocation2]  }
  0x54   : > { %p1440_p12 = scmp.ne.s32.totalorder %s1710_s10, %s1439_s30  ;;  %s1444_s16 = sshll.u32 %s1530_s15, 4  ;;  %s1445_s16 = int_to_ptr.vmem [resolvable:$false] %s1444_s16 }
  0x55   : > { %s1446_s9 = scalar_lea.vmem %s1445_s16, 256  ;;  %p1447_p4 = scmp.lt.s32.totalorder %s1710_s10, %s1445_s16 }
  0x56   : > { %p1442_p2 = pnand %p1440_p12, %p1426_p0  ;;  %p1448_p13 = scmp.lt.s32.totalorder %s1446_s9, %s1439_s30 }
  0x58   : > { %p1443_p5 = pneg %p1442_p2  ;;  %p1449_p6 = por %p1448_p13, %p1447_p4 }
  0x5a   : > { %p1450_p10 = pnand %p1449_p6, %p1443_p5 }
  0x5c   : > { %1453 = shalt.err (!%p1450_p10)
}
  0x5d   : > { %1282 = dma.hbm_to_vmem [thread:$0]  (!%p1712_p11), %s1708_s8, 128, %s1710_s10, %s209_s28  }
  0x5e   : > { %228 = sbr.rel (%p1615_p8) target bundleno = 2263 (0x8d7), region = 40  ;;  %s1744_s12 = sand.u32 (!%p1615_p8), 1, %s1516_s19  }
  0x5f   : > { %s1128_s13 = sshll.u32 (!%p1615_p8), %s1744_s12, 3  ;;  %s231_s29 = scalar_lea.sflag (!%p1615_p8), [#allocation3], %s1744_s12 }
  0x60   : > { %s234_s17 = scalar_lea.vmem (!%p1615_p8), [#allocation2], %s1128_s13  ;;  %p1937_p4 = scmp.ne.s32.totalorder (!%p1615_p8), %s1930_s24, 0 }
  0x65   : > { %1499 = dma.done.wait (%p1937_p4), %s231_s29, 128  }
  0x66   : > { %1501 = vsyncadd (%p1937_p4), %s231_s29, 4294967168  ;;  %p1938_p5 = scmp.eq.s32.totalorder %s1596_s22, 0 }
  0x68   : > { %1503 = dma.done.wait (%p1938_p5), [#allocation6], 512   ;;  %p1939_p8 = pmov %p1938_p5 }
  0x69   : > { %v1531_v0 = vmov 0.0   ;;  %vm1532_vm0 = vmmov 0   ;;  %v1342_v1 = vld [vmem:[#allocation5] sm:$0xff]   ;;  %v1343_v2 = vld [vmem:[#allocation5 + $0x8] sm:$0xff]   ;;  %v270_v3 = vld [vmem:[%s234_s17] sm:$0xff]  ;;  %vm295_vm1 = vcmask 261120   ;;  %v391_v17 = vlaneseq }
  0x6a   : > { %1505 = vsyncadd (%p1939_p8), [#allocation6], 4294966784  ;;  %1180 = vmatprep.subr.bf16.mxu0 %v1531_v0  ;;  %1184 = vmatprep.mubr.msk.bf16.mxu0 %vm1532_vm0, %v1531_v0  ;;  %v271_v4 = vpack.c.bf16 %v270_v3, %v270_v3  ;;  %v1132_v5 = vld [vmem:[%s1923_s2] ss:$0 sm:$0xff]  ;;  %s1533_s8 = smov 120   ;;  %s1534_s10 = smov 96  }
  0x6b   : > { %1188 = vmatprep.subr.bf16.mxu1 %v1531_v0  ;;  %1190 = vmatprep.mubr.msk.bf16.mxu1 %vm1532_vm0, %v1531_v0  ;;  %s1535_s11 = smov 88   ;;  %vm344_vm2 = vcmask 64512   ;;  %v1787_v18 = vshrl.u32 %v391_v17, 7  ;;  %v1789_v19 = vand.u32 127, %v391_v17  ;;  %s1536_s28 = smov 56   ;;  %vm417_vm4 = vcmask 1043456  }
  0x6c   : > { %1181 = vmatpush3.bf16.msra.mxu0 %v1342_v1  ;;  %s1537_s7 = smov 64   ;;  %s1538_s6 = smov 80   ;;  %v465_v48 = vld [vmem:[#allocation7] sm:$0xf]  ;;  %v584_v50 = vld [vmem:[#allocation7 + $0x4] sm:$0xf] }
  0x6d   : > { %1182 = vmatprep.subr.bf16.mxu0 %v1531_v0  ;;  %vm395_vm3 = vcmp.ge.s32.totalorder %v1787_v18, %v1789_v19  ;;  %s1539_s30 = smov 112   ;;  %s1540_s15 = smov 72   ;;  %v635_v49 = vsel %vm417_vm4, %v465_v48, 0  ;;  %v589_v51 = vsel %vm417_vm4, %v584_v50, 0 }
  0x6e   : > { %s1541_s16 = smov 48   ;;  %s1542_s9 = smov 104  }
  0x6f   : > { %s1543_s29 = smov 40   ;;  %s1150_s26 = sshll.u32 %s1596_s22, 7 }
  0x70   : > { %1183 = vmatpush3.bf16.msra.mxu0 %v1343_v2  ;;  %s1018_s22 = scalar_lea.sflag [#allocation4], %s1744_s12  ;;  %p1940_p0 = scmp.ne.s32.totalorder %s1935_s23, 0 }
  0x71   : > { %1194 = vmatprep.subr.bf16.mxu0 %v1531_v0 }
  0x73   : > { %1185 = vmatmul.mubr.msk.bf16.vlgmr.msra.gmra.mrb[0].mxu0 %vm295_vm1, %v271_v4 }
  0x74   : > { %1196 = vmatprep.mubr.msk.bf16.mxu0 %vm1532_vm0, %v1531_v0 }
 0x146   : > { %v333_v6 = vpop.f32.mrb[0].mxu0 }
 0x147   : > { %v334_v7 = vadd.f32 %v1132_v5, %v333_v6  ;;  %v1186_v8 = vpop.f32.mrb[1].mxu0 }
 0x148   : > { %v336_v9 = vpop.f32.mrb[2].mxu0 }
 0x149   : > { %v1771_v10 = vpack.c.bf16 %v334_v7, %v334_v7  ;;  %v1187_v11 = vpop.f32.mrb[3].mxu0 }
 0x14b   : > { %466 = vrot.lane.b32.xlu1 %v1771_v10, %s1533_s8  ;;  %342 = vrot.lane.b32.xlu0 %v1771_v10, %s1534_s10  ;;  %s268_s8 = scalar_lea.vmem [#allocation8], %s1128_s13  ;;  %s1544_s13 = smov [#allocation8]  }
 0x14c   : > { %s1031_s10 = sshll.u32 %s268_s8, 4  ;;  %s1879_s10 = int_to_ptr.vmem [resolvable:$true] %s1031_s10 }
 0x14f   : > { %468 = vrot.lane.b32.xlu0 %v1771_v10, %s1535_s11 }
 0x1bd   : > { %v343_v12 = vpop.permute.xlu0 %342  ;;  %v467_v16 = vpop.permute.xlu1 %466 }
 0x1be   : > { %v349_v13 = vsel %vm344_vm2, %v343_v12, 0 }
 0x1bf   : > { %1189 = vmatpush3.bf16.xpose.msra.mxu1 %v349_v13 }
 0x1c0   : > { %1200 = vmatprep.subr.bf16.mxu1 %v1531_v0 }
 0x1c1   : > { %v469_v14 = vpop.permute.xlu0 %468 }
 0x1c2   : > { %v474_v15 = vsel %vm344_vm2, %v469_v14, 0 }
 0x1c6   : > { %1191 = vmatmul.mubr.msk.bf16.vlgmr.msra.gmra.mrb[0].mxu1 %vm344_vm2, %v1771_v10 }
 0x1c7   : > { %1201 = vmatpush3.bf16.xpose.msra.mxu1 %v474_v15  ;;  %1202 = vmatprep.mubr.msk.bf16.mxu1 %vm1532_vm0, %v1531_v0 }
 0x1c8   : > { %1212 = vmatprep.subr.bf16.mxu1 %v1531_v0 }
 0x1ce   : > { %1203 = vmatmul.mubr.msk.bf16.vlgmr.msra.gmra.mrb[4].mxu1 %vm344_vm2, %v467_v16 }
 0x1cf   : > { %1214 = vmatprep.mubr.msk.bf16.mxu1 %vm1532_vm0, %v1531_v0  ;;  %1213 = vmatpush3.bf16.msra.mxu1 %v589_v51 }
 0x1d0   : > { %1224 = vmatprep.subr.bf16.mxu1 %v1531_v0 }
 0x299   : > { %v385_v20 = vpop.f32.mrb[0].mxu1 }
 0x29a   : > { %v396_v21 = vsel %vm395_vm3, %v385_v20, -1e+30  ;;  %v1192_v22 = vpop.f32.mrb[1].mxu1 }
 0x29b   : > { %v388_v23 = vpop.f32.mrb[2].mxu1  ;;  %v397_v24 = vsel %vm344_vm2, %v396_v21, -inf }
 0x29c   : > { %398 = vmax.xlane.f32.xlu1 %v397_v24  ;;  %v1193_v25 = vpop.f32.mrb[3].mxu1 }
 0x2a1   : > { %v510_v26 = vpop.f32.mrb[4].mxu1 }
 0x2a2   : > { %v516_v27 = vsel %vm395_vm3, %v510_v26, -1e+30  ;;  %v1204_v28 = vpop.f32.mrb[5].mxu1 }
 0x2a3   : > { %v513_v29 = vpop.f32.mrb[6].mxu1  ;;  %v517_v30 = vsel %vm344_vm2, %v516_v27, -inf }
 0x2a4   : > { %518 = vmax.xlane.f32.xlu0 %v517_v30  ;;  %v1205_v31 = vpop.f32.mrb[7].mxu1 }
 0x2ad   : > { %532 = vrot.lane.b32.xlu1 %v1771_v10, %s1536_s28 }
 0x2ba   : > { %412 = vrot.lane.b32.xlu0 %v1771_v10, %s1537_s7  ;;  %s1877_s7 = scalar_lea.hbm %s1926_s5, %s1150_s26 }
 0x2be   : > { %679 = vrot.lane.b32.xlu0 %v1771_v10, %s1538_s6  ;;  %s1454_s6 = scalar_lea.vmem %s1879_s10, 128 }
 0x2bf   : > { %p1455_p11 = scmp.ne.s32.totalorder %s1879_s10, %s1454_s6 }
 0x2c1   : > { %p1456_p1 = pnand %p1455_p11, %p1940_p0 }
 0x2c2   : > { %677 = vrot.lane.b32.xlu0 %v1771_v10, %s1539_s30  ;;  %s1458_s30 = sshll.u32 %s1544_s13, 4  ;;  %s1459_s30 = int_to_ptr.vmem [resolvable:$false] %s1458_s30 }
 0x2c3   : > { %p1457_p3 = pneg %p1456_p1  ;;  %p1461_p7 = scmp.lt.s32.totalorder %s1879_s10, %s1459_s30 }
 0x329   : > { %v399_v32 = vpop.xlane.xlu1 %398 }
 0x32a   : > { %v403_v33 = vsub.f32 %v396_v21, %v399_v32  ;;  %v400_v52 = vsub.f32 -inf, %v399_v32 }
 0x32c   : > { %v404_v34 = vmul.f32 1.442695, %v403_v33  ;;  %v401_v53 = vmul.f32 1.442695, %v400_v52 }
 0x32d   : > { %v533_v41 = vpop.permute.xlu1 %532 }
 0x32e   : > { %1344 = vpow2.f32 %v404_v34  ;;  %v538_v44 = vsel %vm417_vm4, %v533_v41, 0 }
 0x331   : > { %v519_v35 = vpop.xlane.xlu0 %518 }
 0x332   : > { %v523_v36 = vsub.f32 %v516_v27, %v519_v35  ;;  %v520_v54 = vsub.f32 -inf, %v519_v35 }
 0x334   : > { %v524_v37 = vmul.f32 1.442695, %v523_v36  ;;  %v521_v56 = vmul.f32 1.442695, %v520_v54 }
 0x335   : > { %v413_v38 = vpop.permute.xlu0 %412 }
 0x336   : > { %v419_v39 = vsel %vm417_vm4, %v413_v38, 0  ;;  %1346 = vpow2.f32 %v524_v37 }
 0x337   : > { %1195 = vmatpush3.bf16.msra.mxu0 %v419_v39  ;;  %1348 = vpow2.f32 %v401_v53 }
 0x338   : > { %1206 = vmatprep.subr.bf16.mxu0 %v1531_v0  ;;  %v1345_v40 = vpop.eup %1344  ;;  %1350 = vpow2.f32 %v521_v56 }
 0x339   : > { %v407_v42 = vsel %vm344_vm2, %v1345_v40, 0.0  ;;  %v411_v43 = vpack.c.bf16 %v1345_v40, %v1345_v40  ;;  %v680_v55 = vpop.permute.xlu0 %679 }
 0x33a   : > { %408 = vadd.xlane.f32.xlu0 %v407_v42  ;;  %v685_v22 = vsel %vm344_vm2, %v680_v55, 0 }
 0x33b   : > { %1197 = vmatmul.mubr.msk.bf16.vlgmr.msra.gmra.mrb[4].mxu0 %vm344_vm2, %v411_v43 }
 0x33c   : > { %1207 = vmatpush3.bf16.msra.mxu0 %v538_v44  ;;  %1208 = vmatprep.mubr.msk.bf16.mxu0 %vm1532_vm0, %v1531_v0 }
 0x33d   : > { %1218 = vmatprep.subr.bf16.mxu0 %v1531_v0  ;;  %v678_v57 = vpop.permute.xlu0 %677 }
 0x340   : > { %v1347_v45 = vpop.eup %1346 }
 0x341   : > { %v527_v46 = vsel %vm344_vm2, %v1347_v45, 0.0  ;;  %v531_v47 = vpack.c.bf16 %v1347_v45, %v1347_v45  ;;  %v1349_v58 = vpop.eup %1348 }
 0x342   : > { %528 = vadd.xlane.f32.xlu1 %v527_v46  ;;  %v406_v60 = vmul.f32 0.0, %v1349_v58  ;;  %v1351_v62 = vpop.eup %1350 }
 0x343   : > { %1209 = vmatmul.mubr.msk.bf16.vlgmr.msra.gmra.mrb[8].mxu0 %vm344_vm2, %v531_v47  ;;  %v526_v1 = vmul.f32 0.0, %v1351_v62 }
 0x344   : > { %1220 = vmatprep.mubr.msk.bf16.mxu0 %vm1532_vm0, %v1531_v0  ;;  %1219 = vmatpush3.bf16.msra.mxu0 %v635_v49  ;;  %v795_v49 = vld [vmem:[#allocation7 + $0x8] sm:$0xf] }
 0x345   : > { %1230 = vmatprep.subr.bf16.mxu0 %v1531_v0  ;;  %v800_v50 = vsel %vm417_vm4, %v795_v49, 0 }
 0x350   : > { %845 = vrot.lane.b32.xlu0 %v1771_v10, %s1540_s15  ;;  %s1460_s15 = scalar_lea.vmem %s1459_s30, 256 }
 0x351   : > { %p1462_p9 = scmp.lt.s32.totalorder %s1460_s15, %s1454_s6 }
 0x353   : > { %p1463_p12 = por %p1462_p9, %p1461_p7 }
 0x355   : > { %p1464_p2 = pnand %p1463_p12, %p1457_p3 }
 0x3c7   : > { %v409_v59 = vpop.xlane.xlu0 %408 }
 0x3c8   : > { %v410_v61 = vadd.f32 %v409_v59, %v406_v60 }
 0x3ca   : > { %1352 = vrcp.f32 %v410_v61 }
 0x3cb   : > { %v846_v44 = vpop.permute.xlu0 %845 }
 0x3cc   : > { %v851_v47 = vsel %vm344_vm2, %v846_v44, 0 }
 0x3cf   : > { %v529_v63 = vpop.xlane.xlu1 %528 }
 0x3d0   : > { %v530_v2 = vadd.f32 %v529_v63, %v526_v1 }
 0x3d2   : > { %1354 = vrcp.f32 %v530_v2 }
 0x3d4   : > { %v1353_v6 = vpop.eup %1352 }
 0x3dc   : > { %v1355_v15 = vpop.eup %1354 }
 0x40e   : > { %v455_v3 = vpop.f32.mrb[4].mxu0 }
 0x40f   : > { %v461_v4 = vadd.f32 %v455_v3, %v406_v60  ;;  %v1198_v5 = vpop.f32.mrb[5].mxu0 }
 0x410   : > { %v458_v7 = vpop.f32.mrb[6].mxu0 }
 0x411   : > { %v463_v8 = vmul.f32 %v1353_v6, %v461_v4  ;;  %v1199_v9 = vpop.f32.mrb[7].mxu0 }
 0x413   : > { %v464_v11 = vpack.c.bf16 %v463_v8, %v463_v8 }
 0x415   : > { %1221 = vmatmul.mubr.msk.bf16.vlgmr.msra.gmra.mrb[12].mxu0 %vm344_vm2, %v464_v11 }
 0x416   : > { %v574_v12 = vpop.f32.mrb[8].mxu0  ;;  %1232 = vmatprep.mubr.msk.bf16.mxu0 %vm1532_vm0, %v1531_v0 }
 0x417   : > { %v580_v13 = vadd.f32 %v574_v12, %v526_v1  ;;  %v1210_v14 = vpop.f32.mrb[9].mxu0 }
 0x418   : > { %v577_v16 = vpop.f32.mrb[10].mxu0 }
 0x419   : > { %v582_v17 = vmul.f32 %v1355_v15, %v580_v13  ;;  %v1211_v20 = vpop.f32.mrb[11].mxu0 }
 0x41a   : > { %v961_v20 = vld [vmem:[#allocation7 + $0xc] sm:$0xf] }
 0x41b   : > { %v583_v21 = vpack.c.bf16 %v582_v17, %v582_v17 }
 0x41d   : > { %1215 = vmatmul.mubr.msk.bf16.vlgmr.msra.gmra.mrb[8].mxu1 %vm344_vm2, %v583_v21  ;;  %v966_v21 = vsel %vm417_vm4, %v961_v20, 0 }
 0x41e   : > { %1225 = vmatpush3.bf16.xpose.msra.mxu1 %v685_v22  ;;  %1226 = vmatprep.mubr.msk.bf16.mxu1 %vm1532_vm0, %v1531_v0 }
 0x41f   : > { %1236 = vmatprep.subr.bf16.mxu1 %v1531_v0 }
 0x425   : > { %1227 = vmatmul.mubr.msk.bf16.vlgmr.msra.gmra.mrb[12].mxu1 %vm344_vm2, %v678_v57 }
 0x426   : > { %1238 = vmatprep.mubr.msk.bf16.mxu1 %vm1532_vm0, %v1531_v0  ;;  %1237 = vmatpush3.bf16.msra.mxu1 %v800_v50 }
 0x427   : > { %1248 = vmatprep.subr.bf16.mxu1 %v1531_v0 }
 0x4e8   : > { %v671_v23 = vpop.f32.mrb[12].mxu0 }
 0x4e9   : > { %v1222_v24 = vpop.f32.mrb[13].mxu0 }
 0x4ea   : > { %v674_v25 = vpop.f32.mrb[14].mxu0 }
 0x4eb   : > { %v1223_v26 = vpop.f32.mrb[15].mxu0 }
 0x4f0   : > { %v625_v27 = vpop.f32.mrb[8].mxu1 }
 0x4f1   : > { %v1833_v28 = vadd.f32 %v671_v23, %v625_v27  ;;  %v1216_v29 = vpop.f32.mrb[9].mxu1 }
 0x4f2   : > { %v628_v30 = vpop.f32.mrb[10].mxu1 }
 0x4f3   : > { %v1217_v31 = vpop.f32.mrb[11].mxu1 }
 0x4f8   : > { %v721_v32 = vpop.f32.mrb[12].mxu1 }
 0x4f9   : > { %v727_v33 = vsel %vm395_vm3, %v721_v32, -1e+30  ;;  %v1228_v34 = vpop.f32.mrb[13].mxu1 }
 0x4fa   : > { %v724_v35 = vpop.f32.mrb[14].mxu1  ;;  %v728_v36 = vsel %vm344_vm2, %v727_v33, -inf }
 0x4fb   : > { %729 = vmax.xlane.f32.xlu1 %v728_v36  ;;  %v1229_v37 = vpop.f32.mrb[15].mxu1  ;;  %v1148_v36 = vld [vmem:[%s1925_s4] ss:$0 sm:$0xff] }
 0x50c   : > { %743 = vrot.lane.b32.xlu1 %v1771_v10, %s1541_s16 }
 0x510   : > { %843 = vrot.lane.b32.xlu1 %v1771_v10, %s1542_s9 }
 0x588   : > { %v730_v38 = vpop.xlane.xlu1 %729 }
 0x589   : > { %v734_v39 = vsub.f32 %v727_v33, %v730_v38  ;;  %v731_v51 = vsub.f32 -inf, %v730_v38 }
 0x58b   : > { %v735_v40 = vmul.f32 1.442695, %v734_v39  ;;  %v732_v52 = vmul.f32 1.442695, %v731_v51 }
 0x58c   : > { %v744_v41 = vpop.permute.xlu1 %743 }
 0x58d   : > { %v749_v42 = vsel %vm417_vm4, %v744_v41, 0  ;;  %1356 = vpow2.f32 %v735_v40 }
 0x58e   : > { %1231 = vmatpush3.bf16.msra.mxu0 %v749_v42  ;;  %1358 = vpow2.f32 %v732_v52 }
 0x58f   : > { %1242 = vmatprep.subr.bf16.mxu0 %v1531_v0 }
 0x590   : > { %v844_v48 = vpop.permute.xlu1 %843 }
 0x597   : > { %v1357_v43 = vpop.eup %1356 }
 0x598   : > { %v738_v45 = vsel %vm344_vm2, %v1357_v43, 0.0  ;;  %v742_v46 = vpack.c.bf16 %v1357_v43, %v1357_v43  ;;  %v1359_v53 = vpop.eup %1358 }
 0x599   : > { %739 = vadd.xlane.f32.xlu1 %v738_v45  ;;  %v737_v55 = vmul.f32 0.0, %v1359_v53 }
 0x59a   : > { %1233 = vmatmul.mubr.msk.bf16.vlgmr.msra.gmra.mrb[16].mxu0 %vm344_vm2, %v742_v46 }
 0x59b   : > { %1243 = vmatpush3.bf16.xpose.msra.mxu0 %v851_v47  ;;  %1244 = vmatprep.mubr.msk.bf16.mxu0 %vm1532_vm0, %v1531_v0 }
 0x59c   : > { %1254 = vmatprep.subr.bf16.mxu0 %v1531_v0 }
 0x5a2   : > { %1245 = vmatmul.mubr.msk.bf16.vlgmr.msra.gmra.mrb[20].mxu0 %vm344_vm2, %v844_v48 }
 0x5a3   : > { %1256 = vmatprep.mubr.msk.bf16.mxu0 %vm1532_vm0, %v1531_v0  ;;  %1255 = vmatpush3.bf16.msra.mxu0 %v966_v21 }
 0x626   : > { %v740_v54 = vpop.xlane.xlu1 %739 }
 0x627   : > { %v741_v56 = vadd.f32 %v740_v54, %v737_v55 }
 0x629   : > { %1360 = vrcp.f32 %v741_v56 }
 0x633   : > { %v1361_v60 = vpop.eup %1360 }
 0x66d   : > { %v785_v57 = vpop.f32.mrb[16].mxu0 }
 0x66e   : > { %v791_v58 = vadd.f32 %v785_v57, %v737_v55  ;;  %v1234_v59 = vpop.f32.mrb[17].mxu0 }
 0x66f   : > { %v788_v61 = vpop.f32.mrb[18].mxu0 }
 0x670   : > { %v793_v62 = vmul.f32 %v1361_v60, %v791_v58  ;;  %v1235_v63 = vpop.f32.mrb[19].mxu0 }
 0x672   : > { %v794_v1 = vpack.c.bf16 %v793_v62, %v793_v62 }
 0x674   : > { %1239 = vmatmul.mubr.msk.bf16.vlgmr.msra.gmra.mrb[16].mxu1 %vm344_vm2, %v794_v1 }
 0x675   : > { %v887_v2 = vpop.f32.mrb[20].mxu0  ;;  %1250 = vmatprep.mubr.msk.bf16.mxu1 %vm1532_vm0, %v1531_v0 }
 0x676   : > { %v893_v3 = vsel %vm395_vm3, %v887_v2, -1e+30  ;;  %v1246_v4 = vpop.f32.mrb[21].mxu0 }
 0x677   : > { %v890_v5 = vpop.f32.mrb[22].mxu0  ;;  %v894_v6 = vsel %vm344_vm2, %v893_v3, -inf }
 0x678   : > { %895 = vmax.xlane.f32.xlu0 %v894_v6  ;;  %v1247_v7 = vpop.f32.mrb[23].mxu0 }
 0x68e   : > { %909 = vrot.lane.b32.xlu0 %v1771_v10, %s1543_s29 }
 0x705   : > { %v896_v8 = vpop.xlane.xlu0 %895 }
 0x706   : > { %v900_v9 = vsub.f32 %v893_v3, %v896_v8  ;;  %v897_v22 = vsub.f32 -inf, %v896_v8 }
 0x708   : > { %v901_v11 = vmul.f32 1.442695, %v900_v9  ;;  %v898_v23 = vmul.f32 1.442695, %v897_v22 }
 0x709   : > { %v910_v12 = vpop.permute.xlu0 %909 }
 0x70a   : > { %v915_v13 = vsel %vm417_vm4, %v910_v12, 0  ;;  %1362 = vpow2.f32 %v901_v11 }
 0x70b   : > { %1249 = vmatpush3.bf16.msra.mxu1 %v915_v13  ;;  %1364 = vpow2.f32 %v898_v23 }
 0x714   : > { %v1363_v0 = vpop.eup %1362 }
 0x715   : > { %v904_v18 = vsel %vm344_vm2, %v1363_v0, 0.0  ;;  %v908_v19 = vpack.c.bf16 %v1363_v0, %v1363_v0  ;;  %v1365_v24 = vpop.eup %1364 }
 0x716   : > { %905 = vadd.xlane.f32.xlu1 %v904_v18  ;;  %v903_v26 = vmul.f32 0.0, %v1365_v24 }
 0x717   : > { %1251 = vmatmul.mubr.msk.bf16.vlgmr.msra.gmra.mrb[20].mxu1 %vm344_vm2, %v908_v19 }
 0x747   : > { %v836_v14 = vpop.f32.mrb[16].mxu1 }
 0x748   : > { %v842_v15 = vadd.f32 %v836_v14, %v1833_v28  ;;  %v1240_v16 = vpop.f32.mrb[17].mxu1 }
 0x749   : > { %v839_v10 = vpop.f32.mrb[18].mxu1 }
 0x74a   : > { %v1241_v17 = vpop.f32.mrb[19].mxu1 }
 0x7a3   : > { %v906_v25 = vpop.xlane.xlu1 %905 }
 0x7a4   : > { %v907_v27 = vadd.f32 %v906_v25, %v903_v26 }
 0x7a6   : > { %1366 = vrcp.f32 %v907_v27 }
 0x7b0   : > { %v1367_v31 = vpop.eup %1366 }
 0x7ea   : > { %v951_v29 = vpop.f32.mrb[20].mxu1 }
 0x7eb   : > { %v957_v30 = vadd.f32 %v951_v29, %v903_v26  ;;  %v1252_v28 = vpop.f32.mrb[21].mxu1 }
 0x7ec   : > { %v954_v32 = vpop.f32.mrb[22].mxu1 }
 0x7ed   : > { %v959_v33 = vmul.f32 %v1367_v31, %v957_v30  ;;  %v1253_v34 = vpop.f32.mrb[23].mxu1 }
 0x7ef   : > { %v960_v35 = vpack.c.bf16 %v959_v33, %v959_v33 }
 0x7f1   : > { %1257 = vmatmul.mubr.msk.bf16.vlgmr.msra.gmra.mrb[24].mxu0 %vm344_vm2, %v960_v35 }
 0x8c4   : > { %v1002_v37 = vpop.f32.mrb[24].mxu0 }
 0x8c5   : > { %v1008_v38 = vadd.f32 %v1002_v37, %v842_v15  ;;  %v1258_v39 = vpop.f32.mrb[25].mxu0 }
 0x8c6   : > { %v1005_v40 = vpop.f32.mrb[26].mxu0 }
 0x8c7   : > { %v1015_v41 = vadd.f32 %v1148_v36, %v1008_v38  ;;  %v1259_v42 = vpop.f32.mrb[27].mxu0 }
 0x8c9   : > { %1016 = vst [vmem:[%s268_s8] sm:$0xff] %v1015_v41 }
 0x8ca   : > { %1467 = shalt.err (!%p1464_p2)
}
 0x8cb   : > { %s1468_s12 = scalar_lea.hbm %s1877_s7, 128  ;;  %s1472_s29 = scalar_lea.hbm %s1926_s5, 256 }
 0x8cc   : > { %p1469_p13 = scmp.ne.s32.totalorder %s1877_s7, %s1468_s12  ;;  %p1473_p4 = scmp.lt.u32.totalorder %s1877_s7, %s1926_s5 }
 0x8cd   : > { %p1474_p5 = scmp.lt.u32.totalorder %s1472_s29, %s1468_s12  ;;  %p1476_p11 = scmp.lt.u32.totalorder %s1468_s12, %s1877_s7 }
 0x8ce   : > { %p1470_p6 = pnand %p1469_p13, %p1940_p0 }
 0x8cf   : > { %p1475_p8 = por %p1474_p5, %p1473_p4 }
 0x8d0   : > { %p1471_p10 = pneg %p1470_p6 }
 0x8d1   : > { %p1477_p1 = por %p1476_p11, %p1475_p8 }
 0x8d3   : > { %p1478_p3 = pnand %p1477_p1, %p1471_p10 }
 0x8d5   : > { %1481 = shalt.err (!%p1478_p3)
}
 0x8d6   : > { %1270 = dma.vmem_to_hbm [thread:$0]  (%p1940_p0), %s1879_s10, 128, %s1877_s7, %s1018_s22  }
 0x8d7 PF: > { %s1043_s26 = sand.u32 1, %s1512_s18   ;;  %p1941_p7 = scmp.ne.s32.totalorder %s1931_s25, 0 }
 0x8d8   : > { %p1942_p9 = scmp.ge.s32.totalorder %s1524_s21, 2  ;;  %s1044_s8 = scalar_lea.sflag [#allocation4], %s1043_s26 }
 0x8da   : > { %p1284_p12 = pnand %p1942_p9, %p1941_p7 }
 0x8dc   : > { %1507 = dma.done.wait (!%p1284_p12), %s1044_s8, 128  }
 0x8dd   : > { %1509 = vsyncadd (!%p1284_p12), %s1044_s8, 4294967168  ;;  %p19_p2 = scmp.ge.s32.totalorder %s1685_s14, 4   ;;  %s1943_s18 = smov %s1516_s19 }
 0x8de   : > { %s1944_s19 = smov %s1520_s20  ;;  %s1945_s20 = smov %s1701_s27 }
 0x8df   : > { %s1946_s21 = smov %s1685_s14  ;;  %21 = sbr.rel (!%p19_p2) target bundleno = 6 (0x6), region = 93 }
 0x8e6   :  { %1049 = vsyncpa [#allocation3], 1 }
 0x8e7   :  { %1051 = vsyncpa [#allocation3 + $0x1], 1 }
 0x8e8   :  { %1052 = vsyncpa [#allocation6], 1 }
 0x8e9   :  { %1053 = vsyncpa [#allocation4], 1 }
 0x8ea   :  { %1055 = vsyncpa [#allocation4 + $0x1], 1 }

</bundles_post_ra>
